<compile_context>
chip_gen: v5e
topology: v5e:2x2
jax: 0.10.0
libtpu: 0.0.40
codegen_flags: <defaults>
</compile_context>

<pallas_src>
import jax
import jax.numpy as jnp
from jax.experimental import pallas as pl
from jax.experimental.pallas import tpu as pltpu


# -----------------------------------------------------------------------------
# Pallas kernel: one skinny MXU matmul per block.  out_block = A_block @ W_block
# -----------------------------------------------------------------------------
def _combined_basis_matmul_kernel(a_ref, w_ref, o_ref):
    o_ref[...] = jnp.dot(
        a_ref[...], w_ref[...],
        preferred_element_type=jnp.float32,
        precision=jax.lax.Precision.HIGHEST,   # f32-accurate MXU passes
    )


def _default_tile_maxes():
    """Generation-aware output-block sizing (stays under scoped-VMEM defaults)."""
    try:
        kind = jax.devices()[0].device_kind.lower()
    except Exception:
        kind = ""
    if "v6" in kind or "v7" in kind:
        # 512 x 4096 f32 = 8 MiB output block; ~16 MiB double-buffered + small
        # A / W blocks fits the 32 MiB scoped-VMEM default on v6e / v7x.
        return 512, 4096
    # Conservative default (incl. v5e's 16 MiB scoped-VMEM default):
    # 512 x 2048 f32 = 4 MiB output block, ~8.5 MiB total double-buffered.
    return 512, 2048


def combined_radial_basis_matmul(a, w, *, row_tile_max=None, lane_tile_max=None):
    """a: (N, K) f32 row table; w: (K, Lp) f32 lane table (K, Lp multiples of 128
    or full dims).  Returns (N, Lp) f32 = a @ w with lane-dense stores."""
    if row_tile_max is None or lane_tile_max is None:
        d_row, d_lane = _default_tile_maxes()
        row_tile_max = d_row if row_tile_max is None else row_tile_max
        lane_tile_max = d_lane if lane_tile_max is None else lane_tile_max

    n_rows, k = a.shape
    k_w, n_lanes = w.shape
    assert k == k_w

    row_tile = n_rows if n_rows <= row_tile_max else row_tile_max
    lane_tile = n_lanes if n_lanes <= lane_tile_max else lane_tile_max
    # Lane axis OUTER, row axis INNER: W's block index is constant across the
    # inner row steps (no redundant re-DMA of the weight table); only the tiny
    # A row-block changes per inner step.
    grid = (pl.cdiv(n_lanes, lane_tile), pl.cdiv(n_rows, row_tile))

    return pl.pallas_call(
        _combined_basis_matmul_kernel,
        out_shape=jax.ShapeDtypeStruct((n_rows, n_lanes), jnp.float32),
        grid=grid,
        in_specs=[
            pl.BlockSpec((row_tile, k), lambda c, r: (r, 0)),     # A (per row block)
            pl.BlockSpec((k, lane_tile), lambda c, r: (0, c)),    # W (per lane block)
        ],
        out_specs=pl.BlockSpec((row_tile, lane_tile), lambda c, r: (r, c)),
        compiler_params=pltpu.CompilerParams(
            dimension_semantics=("parallel", "parallel")),
    )(a, w)


# -----------------------------------------------------------------------------
# CombinedRadialKernelBasis equivalent (2 scalar kernels, deterministic bases)
# -----------------------------------------------------------------------------
class CombinedRadialKernelBasisPallas:
    """Combines two scalar radial kernel bases (the num_kernels == 2 case):
         kernel 1: Gaussian radial basis over ||p_diff||             (size b1)
         kernel 2: cosine basis over (||q_out - q_in|| + ||p_diff||) (size b2)
    forward() == einsum('qrpi,qrpj->qrpij').view(Qo, Qi, P, b1*b2), computed as
    a single skinny static-weight matmul on the MXU.
    """

    def __init__(self, q_out_vecs, q_in_vecs, P_diff_vectors, basis_sizes=(4, 8),
                 *, row_tile_max=None, lane_tile_max=None):
        self.Q_out = int(q_out_vecs.shape[0])
        self.Q_in = int(q_in_vecs.shape[0])
        self.num_P_diff_vectors = int(P_diff_vectors.shape[0])
        b1, b2 = int(basis_sizes[0]), int(basis_sizes[1])
        self.basis_sizes = (b1, b2)
        self.scalar_basis_size = b1 * b2
        self._row_tile_max = row_tile_max
        self._lane_tile_max = lane_tile_max

        P = self.num_P_diff_vectors
        B = self.scalar_basis_size
        N = self.Q_out * self.Q_in
        L = P * B

        # --- scalar-kernel parameters (all static; no learned params) --------
        radii = jnp.linalg.norm(P_diff_vectors, axis=-1).astype(jnp.float32)   # (P,)
        r_max = jnp.maximum(jnp.max(radii), 1e-6)
        centers = (jnp.linspace(0.0, 1.0, b1) * r_max).astype(jnp.float32)     # (b1,)
        sigma = r_max / b1 + 1e-3
        freqs = jnp.arange(1, b2 + 1, dtype=jnp.float32)                       # (b2,)
        dq = jnp.linalg.norm(
            q_out_vecs[:, None, :] - q_in_vecs[None, :, :], axis=-1
        ).astype(jnp.float32)                                                  # (Qo, Qi)

        # --- angle-addition reformulation: out = A @ W ------------------------
        # lane l = p*(b1*b2) + i*b2 + j  (kernel-1 basis index i major, j minor)
        gauss = jnp.exp(
            -0.5 * ((radii[:, None] - centers[None, :]) / sigma) ** 2)         # (P, b1)
        rf = radii[:, None] * freqs[None, :]                                   # (P, b2)
        cos_rf, sin_rf = jnp.cos(rf), jnp.sin(rf)
        eye = jnp.eye(b2, dtype=jnp.float32)
        w_cos = jnp.einsum("kj,pi,pj->kpij", eye, gauss, cos_rf)               # (b2,P,b1,b2)
        w_sin = jnp.einsum("kj,pi,pj->kpij", eye, gauss, -sin_rf)              # (b2,P,b1,b2)
        w = jnp.concatenate([w_cos, w_sin], axis=0).reshape(2 * b2, L)         # (2*b2, L)

        dqf = dq.reshape(N, 1) * freqs[None, :]                                # (N, b2)
        a = jnp.concatenate([jnp.cos(dqf), jnp.sin(dqf)], axis=1)              # (N, 2*b2)

        # --- zero-pad to aligned shapes: rows -> x8, K & lanes -> x128 --------
        k_real = 2 * b2
        k_pad = ((k_real + 127) // 128) * 128
        n_pad = ((N + 7) // 8) * 8
        l_pad = ((L + 127) // 128) * 128
        a = jnp.pad(a, ((0, n_pad - N), (0, k_pad - k_real)))
        w = jnp.pad(w, ((0, k_pad - k_real), (0, l_pad - L)))

        self._a = a.astype(jnp.float32)          # (n_pad, k_pad)
        self._w = w.astype(jnp.float32)          # (k_pad, l_pad)
        self._N, self._n_pad = N, n_pad
        self._L, self._l_pad = L, l_pad

        # kept only for the pure-JAX reference check
        self._radii, self._centers, self._sigma = radii, centers, sigma
        self._freqs, self._dq = freqs, dq

        # TODO(synk): the 3..5-kernel einsum formulas extend W's lane axis to
        # P*prod(b_k) with the extra per-lane factors folded in (and A's K axis
        # if row-dependent); the same single-matmul kernel then applies.

    def __call__(self):
        Qo, Qi, P = self.Q_out, self.Q_in, self.num_P_diff_vectors
        out2d = combined_radial_basis_matmul(
            self._a, self._w,
            row_tile_max=self._row_tile_max, lane_tile_max=self._lane_tile_max)
        if self._n_pad != self._N or self._l_pad != self._L:
            out2d = out2d[:self._N, :self._L]     # drop zero padding rows/lanes
        # Row-major compatible reshape to (Qo, Qi, P, b1*b2).
        return out2d.reshape(Qo, Qi, P, self.scalar_basis_size)

    def reference(self):
        """Pure-JAX reference of the PyTorch forward (einsum + view)."""
        Qo, Qi, P = self.Q_out, self.Q_in, self.num_P_diff_vectors
        b1, b2 = self.basis_sizes
        s1 = jnp.exp(-0.5 * ((self._radii[:, None] - self._centers[None, :])
                             / self._sigma) ** 2)                    # (P, b1)
        s1 = jnp.broadcast_to(s1[None, None], (Qo, Qi, P, b1))
        d = self._dq[:, :, None] + self._radii[None, None, :]        # (Qo, Qi, P)
        s2 = jnp.cos(d[..., None] * self._freqs)                     # (Qo, Qi, P, b2)
        return jnp.einsum("qrpi,qrpj->qrpij", s1, s2).reshape(Qo, Qi, P, -1)


# -----------------------------------------------------------------------------
if __name__ == "__main__":
    key = jax.random.PRNGKey(0)
    k_qo, k_qi, k_qo2, k_qi2 = jax.random.split(key, 4)

    def make_p_diff(P_kernel_size):
        r = (P_kernel_size - 1) // 2
        ax = jnp.arange(-r, r + 1, dtype=jnp.float32)
        gx, gy, gz = jnp.meshgrid(ax, ax, ax, indexing="ij")
        return jnp.stack([gx.ravel(), gy.ravel(), gz.ravel()], axis=-1)

    P_diff_vectors = make_p_diff(3)                     # (27, 3)

    # --- test 1: single-block path (original demo shapes) --------------------
    q_out_vecs = jax.random.normal(k_qo, (2, 3), dtype=jnp.float32)
    q_in_vecs = jax.random.normal(k_qi, (3, 3), dtype=jnp.float32)
    m1 = CombinedRadialKernelBasisPallas(
        q_out_vecs, q_in_vecs, P_diff_vectors, basis_sizes=(4, 8))
    out1 = jax.block_until_ready(m1())
    ref1 = m1.reference()
    assert out1.shape == (2, 3, 27, 32), out1.shape
    assert jnp.allclose(out1, ref1, atol=1e-4, rtol=1e-4), float(
        jnp.max(jnp.abs(out1 - ref1)))

    # --- test 2: multi-block tiled path (2x4 grid, ragged final lane block) --
    q_out2 = jax.random.normal(k_qo2, (4, 3), dtype=jnp.float32)
    q_in2 = jax.random.normal(k_qi2, (8, 3), dtype=jnp.float32)
    m2 = CombinedRadialKernelBasisPallas(
        q_out2, q_in2, P_diff_vectors, basis_sizes=(4, 8),
        row_tile_max=16, lane_tile_max=256)
    out2 = jax.block_until_ready(m2())
    ref2 = m2.reference()
    assert out2.shape == (4, 8, 27, 32), out2.shape
    assert jnp.allclose(out2, ref2, atol=1e-4, rtol=1e-4), float(
        jnp.max(jnp.abs(out2 - ref2)))

    print("KERNEL_OK")
</pallas_src>

<mosaic_0001>
module attributes {stable_mosaic.version = 11 : i64} {
  func.func @_combined_basis_matmul_kernel(%arg0: i32, %arg1: i32, %arg2: memref<8x128xf32, #tpu.memory_space<vmem>>, %arg3: memref<128x896xf32, #tpu.memory_space<vmem>>, %arg4: memref<8x896xf32, #tpu.memory_space<vmem>>) attributes {dimension_semantics = [#tpu.dimension_semantics<parallel>, #tpu.dimension_semantics<parallel>], iteration_bounds = array<i64: 1, 1>, scalar_prefetch = 0 : i64, scratch_operands = 0 : i64, tpu.core_type = #tpu.core_type<tc>, window_params = [{transform_indices = @transform_0, window_bounds = array<i64: 8, 128>}, {transform_indices = @transform_1, window_bounds = array<i64: 128, 896>}, {transform_indices = @transform_2, window_bounds = array<i64: 8, 896>}]} {
    %c0 = arith.constant 0 : index
    %c0_0 = arith.constant 0 : index
    %0 = vector.load %arg2[%c0, %c0_0] : memref<8x128xf32, #tpu.memory_space<vmem>>, vector<8x128xf32>
    %c0_1 = arith.constant 0 : index
    %c0_2 = arith.constant 0 : index
    %1 = vector.load %arg3[%c0_1, %c0_2] : memref<128x896xf32, #tpu.memory_space<vmem>>, vector<128x896xf32>
    %cst = arith.constant dense<0.000000e+00> : vector<8x896xf32>
    %2 = tpu.matmul %0, %1, %cst {dimension_numbers = #tpu.dot_dimension_numbers<[1], [0], [0], [1], [0, 0, 1, 1], [], []>, precision = #tpu.contract_precision<fp32>} : vector<8x128xf32>, vector<128x896xf32>, vector<8x896xf32> -> vector<8x896xf32>
    %c0_3 = arith.constant 0 : index
    %c0_4 = arith.constant 0 : index
    %3 = vector.load %arg4[%c0_3, %c0_4] : memref<8x896xf32, #tpu.memory_space<vmem>>, vector<8x896xf32>
    tpu.vector_store %arg4[%c0_3, %c0_4], %2 {strides = array<i32>} : memref<8x896xf32, #tpu.memory_space<vmem>>, vector<8x896xf32>,
    return
  }
  func.func @transform_0(%arg0: i32, %arg1: i32) -> (i32, i32) {
    %c0_i32 = arith.constant 0 : i32
    %c0_i32_0 = arith.constant 0 : i32
    return %arg1, %c0_i32 : i32, i32
  }
  func.func @transform_1(%arg0: i32, %arg1: i32) -> (i32, i32) {
    %c0_i32 = arith.constant 0 : i32
    %c0_i32_0 = arith.constant 0 : i32
    return %c0_i32, %arg0 : i32, i32
  }
  func.func @transform_2(%arg0: i32, %arg1: i32) -> (i32, i32) {
    %c0_i32 = arith.constant 0 : i32
    return %arg1, %arg0 : i32, i32
  }
}

</mosaic_0001>

<bundles_post_ra>
// kernel: tpu_custom_call.1
= control target key start
LH: loop header
LB: loop body
LE: loop exit
PB: predicated region body
PF: predicated region fallthrough
CT: control target
= control target key end

     0   :  { %7 = vsyncpa [#allocation3], 0  ;;  %s4413_s0 = inlined_call_operand.hbm [shape: f32[8,128], index: 0, kind: input, shape index: {}]   ;;  %s4414_s1 = inlined_call_operand.hbm [shape: f32[128,896], index: 1, kind: input, shape index: {}]   ;;  %s4415_s2 = inlined_call_operand.hbm [shape: f32[8,896], index: 2, kind: output, shape index: {}]  }
   0x1   :  { %8 = vsyncpa [#allocation6], 0 }
   0x2   :  { %9 = vsyncpa [#allocation4], 0  ;;  %s15_s11 = sshll.u32 %s4413_s0, 4  ;;  %s2650_s12 = smov [#allocation2]   ;;  %s16_s11 = int_to_ptr.hbm [resolvable:$true] %s15_s11 }
   0x3   :  { %s17_s13 = sshll.u32 %s2650_s12, 4  ;;  %s25_s16 = sshll.u32 %s4414_s1, 4  ;;  %s18_s13 = int_to_ptr.vmem [resolvable:$true] %s17_s13  ;;  %s26_s16 = int_to_ptr.hbm [resolvable:$true] %s25_s16 }
   0x4   :  { %20 = dma.hbm_to_vmem [thread:$0]  %s16_s11, 128, %s18_s13, [#allocation3]  }
   0x5   :  { %s2651_s17 = smov [#allocation5]   ;;  %s2652_s19 = smov 896  }
   0x6   :  { %s27_s18 = sshll.u32 %s2651_s17, 4  ;;  %s2653_s20 = smov 56   ;;  %s28_s18 = int_to_ptr.vmem [resolvable:$true] %s27_s18 }
   0x7   :  { %33 = dma.hbm_to_vmem [thread:$0]  %s26_s16, 14336, %s28_s18, [#allocation6], %s2652_s19, %s2652_s19, %s2653_s20  }
   0x8   :  { %2644 = dma.done.wait [#allocation3], 128  }
   0x9   :  { %2645 = vsyncadd [#allocation3], 4294967168 }
   0xa   :  { %2646 = dma.done.wait [#allocation6], 14336  }
   0xb   :  { %2647 = vsyncadd [#allocation6], 4294952960  ;;  %v148_v0 = vld [vmem:[#allocation5 + $0x348] sm:$0xff]  ;;  %v141_v1 = vld [vmem:[#allocation5 + $0x310] sm:$0xff]  ;;  %s2654_s0 = smov [#allocation7]   ;;  %s2556_s23 = sshll.u32 %s4415_s2, 4  ;;  %s2557_s23 = int_to_ptr.hbm [resolvable:$true] %s2556_s23 }
   0xc   :  { %v134_v2 = vld [vmem:[#allocation5 + $0x2d8] sm:$0xff]  ;;  %v2676_v3 = vand.u32 4294901760, %v148_v0  ;;  %v2678_v4 = vand.u32 4294901760, %v141_v1  ;;  %v127_v6 = vld [vmem:[#allocation5 + $0x2a0] sm:$0xff]  ;;  %v120_v7 = vld [vmem:[#allocation5 + $0x268] sm:$0xff]  ;;  %s2554_s1 = sshll.u32 %s2654_s0, 4  ;;  %s2555_s1 = int_to_ptr.vmem [resolvable:$true] %s2554_s1 }
   0xd   :  { %v2680_v5 = vand.u32 4294901760, %v134_v2  ;;  %v113_v8 = vld [vmem:[#allocation5 + $0x230] sm:$0xff]  ;;  %v2682_v9 = vand.u32 4294901760, %v127_v6  ;;  %v2684_v10 = vand.u32 4294901760, %v120_v7  ;;  %v106_v12 = vld [vmem:[#allocation5 + $0x1f8] sm:$0xff]  ;;  %v99_v13 = vld [vmem:[#allocation5 + $0x1c0] sm:$0xff] }
   0xe   :  { %v2686_v11 = vand.u32 4294901760, %v113_v8  ;;  %156 = vmatpush.msra.mxu0 %v2676_v3  ;;  %v2690_v14 = vsub.f32 %v148_v0, %v2676_v3  ;;  %v2693_v15 = vsub.f32 %v141_v1, %v2678_v4  ;;  %v2698_v17 = vand.u32 4294901760, %v106_v12  ;;  %v92_v18 = vld [vmem:[#allocation5 + $0x188] sm:$0xff]  ;;  %352 = vmatpush.msra.mxu3 %v2676_v3  ;;  %v85_v26 = vld [vmem:[#allocation5 + $0x150] sm:$0xff]  ;;  %v78_v36 = vld [vmem:[#allocation5 + $0x118] sm:$0xff] }
   0xf   :  { %v2696_v16 = vsub.f32 %v134_v2, %v2680_v5  ;;  %v2702_v19 = vsub.f32 %v127_v6, %v2682_v9  ;;  %v2705_v20 = vsub.f32 %v120_v7, %v2684_v10  ;;  %v2714_v25 = vand.u32 4294901760, %v99_v13  ;;  %v71_v41 = vld [vmem:[#allocation5 + $0xe0] sm:$0xff]  ;;  %v64_v47 = vld [vmem:[#allocation5 + $0xa8] sm:$0xff]  ;;  %v57_v55 = vld [vmem:[#allocation5 + $0x70] sm:$0xff] }
  0x10   :  { %v2708_v21 = vsub.f32 %v113_v8, %v2686_v11  ;;  %158 = vmatpush.msra.mxu0 %v2678_v4  ;;  %v198_v22 = vand.u32 4294901760, %v2690_v14  ;;  %v204_v23 = vand.u32 4294901760, %v2693_v15  ;;  %299 = vmatpush.msra.mxu2 %v2690_v14  ;;  %v2718_v28 = vand.u32 4294901760, %v92_v18  ;;  %v50_v60 = vld [vmem:[#allocation5 + $0x38] sm:$0xff]  ;;  %v43_v1 = vld [vmem:[#allocation5] sm:$0xff]  ;;  %v149_v7 = vld [vmem:[#allocation5 + $0x350] sm:$0xff] }
  0x11   :  { %v210_v24 = vand.u32 4294901760, %v2696_v16  ;;  %v4428_v27 = vand.u32 4294901760, %v2702_v19  ;;  %v2721_v29 = vsub.f32 %v106_v12, %v2698_v17  ;;  %354 = vmatpush.msra.mxu3 %v2678_v4  ;;  %v4427_v33 = vand.u32 4294901760, %v2705_v20 }
  0x12   :  { %160 = vmatpush.msra.mxu0 %v2680_v5  ;;  %v199_v30 = vsub.f32 %v2690_v14, %v198_v22  ;;  %v205_v31 = vsub.f32 %v2693_v15, %v204_v23  ;;  %302 = vmatpush.msra.mxu2 %v2693_v15  ;;  %v4426_v34 = vand.u32 4294901760, %v2708_v21  ;;  %v2737_v35 = vand.u32 4294901760, %v85_v26 }
  0x13   :  { %v211_v32 = vsub.f32 %v2696_v16, %v210_v24  ;;  %356 = vmatpush.msra.mxu3 %v2680_v5  ;;  %v217_v39 = vsub.f32 %v2702_v19, %v4428_v27  ;;  %v2745_v40 = vsub.f32 %v99_v13, %v2714_v25  ;;  %v4423_v42 = vand.u32 4294901760, %v2721_v29 }
  0x14   :  { %v200_v37 = vand.u32 4294901760, %v199_v30  ;;  %162 = vmatpush.msra.mxu0 %v2682_v9  ;;  %v206_v38 = vand.u32 4294901760, %v205_v31  ;;  %305 = vmatpush.msra.mxu2 %v2696_v16  ;;  %v223_v44 = vsub.f32 %v2705_v20, %v4427_v33  ;;  %v2754_v45 = vand.u32 4294901760, %v78_v36  ;;  %v142_v31 = vld [vmem:[#allocation5 + $0x318] sm:$0xff]  ;;  %v79_v16 = vld [vmem:[#allocation5 + $0x120] sm:$0xff] }
  0x15   :  { %358 = vmatpush.msra.mxu3 %v2682_v9  ;;  %v212_v43 = vand.u32 4294901760, %v211_v32  ;;  %v2757_v46 = vsub.f32 %v92_v18, %v2718_v28  ;;  %v2759_v48 = vand.u32 4294901760, %v71_v41  ;;  %v218_v49 = vand.u32 4294901760, %v217_v39 }
  0x16   :  { %201 = vmatpush.msra.mxu1 %v200_v37  ;;  %164 = vmatpush.msra.mxu0 %v2684_v10  ;;  %v229_v50 = vsub.f32 %v2708_v21, %v4426_v34  ;;  %v4421_v51 = vand.u32 4294901760, %v2745_v40  ;;  %v2769_v52 = vsub.f32 %v85_v26, %v2737_v35  ;;  %v235_v53 = vsub.f32 %v2721_v29, %v4423_v42  ;;  %v107_v42 = vld [vmem:[#allocation5 + $0x200] sm:$0xff] }
  0x17   :  { %308 = vmatpush.msra.mxu2 %v2702_v19  ;;  %360 = vmatpush.msra.mxu3 %v2684_v10  ;;  %v2774_v54 = vand.u32 4294901760, %v64_v47  ;;  %v224_v56 = vand.u32 4294901760, %v223_v44  ;;  %v4420_v57 = vand.u32 4294901760, %v2757_v46  ;;  %v2781_v58 = vsub.f32 %v78_v36, %v2754_v45 }
  0x18   :  { %207 = vmatpush.msra.mxu1 %v206_v38  ;;  %166 = vmatpush.msra.mxu0 %v2686_v11  ;;  %v2784_v59 = vsub.f32 %v71_v41, %v2759_v48  ;;  %v230_v61 = vand.u32 4294901760, %v229_v50  ;;  %v241_v62 = vsub.f32 %v2745_v40, %v4421_v51  ;;  %v4419_v63 = vand.u32 4294901760, %v2769_v52  ;;  %v114_v51 = vld [vmem:[#allocation5 + $0x238] sm:$0xff] }
  0x19   :  { %311 = vmatpush.msra.mxu2 %v2705_v20  ;;  %362 = vmatpush.msra.mxu3 %v2686_v11  ;;  %v2793_v0 = vand.u32 4294901760, %v57_v55  ;;  %v236_v2 = vand.u32 4294901760, %v235_v53  ;;  %v2796_v6 = vsub.f32 %v64_v47, %v2774_v54  ;;  %v247_v8 = vsub.f32 %v2757_v46, %v4420_v57 }
  0x1a   :  { %213 = vmatpush.msra.mxu1 %v212_v43  ;;  %168 = vmatpush.msra.mxu0 %v2698_v17  ;;  %v4418_v12 = vand.u32 4294901760, %v2781_v58  ;;  %v2805_v13 = vand.u32 4294901760, %v50_v60  ;;  %v2807_v18 = vand.u32 4294901760, %v149_v7  ;;  %v4416_v26 = vand.u32 4294901760, %v2784_v59  ;;  %v135_v43 = vld [vmem:[#allocation5 + $0x2e0] sm:$0xff] }
  0x1b   :  { %314 = vmatpush.msra.mxu2 %v2708_v21  ;;  %364 = vmatpush.msra.mxu3 %v2698_v17  ;;  %v2810_v30 = vand.u32 4294901760, %v43_v1  ;;  %v242_v32 = vand.u32 4294901760, %v241_v62  ;;  %v253_v36 = vsub.f32 %v2769_v52, %v4419_v63  ;;  %v2819_v37 = vsub.f32 %v57_v55, %v2793_v0 }
  0x1c   :  { %219 = vmatpush.msra.mxu1 %v218_v49  ;;  %170 = vmatpush.msra.mxu0 %v2714_v25  ;;  %v2821_v38 = vand.u32 4294901760, %v142_v31  ;;  %v4417_v39 = vand.u32 4294901760, %v2796_v6  ;;  %v2827_v41 = vsub.f32 %v149_v7, %v2807_v18  ;;  %v248_v44 = vand.u32 4294901760, %v247_v8 }
  0x1d   :  { %317 = vmatpush.msra.mxu2 %v2721_v29  ;;  %366 = vmatpush.msra.mxu3 %v2714_v25  ;;  %v259_v47 = vsub.f32 %v2781_v58, %v4418_v12  ;;  %v2834_v49 = vsub.f32 %v50_v60, %v2805_v13  ;;  %v2836_v50 = vand.u32 4294901760, %v135_v43  ;;  %v265_v53 = vsub.f32 %v2784_v59, %v4416_v26  ;;  %v121_v12 = vld [vmem:[#allocation5 + $0x270] sm:$0xff] }
  0x1e   :  { %225 = vmatpush.msra.mxu1 %v224_v56  ;;  %172 = vmatpush.msra.mxu0 %v2718_v28  ;;  %v2844_v55 = vsub.f32 %v142_v31, %v2821_v38  ;;  %v128_v56 = vld [vmem:[#allocation5 + $0x2a8] sm:$0xff]  ;;  %v4422_v60 = vand.u32 4294901760, %v2819_v37  ;;  %v2849_v62 = vsub.f32 %v43_v1, %v2810_v30  ;;  %v271_v7 = vsub.f32 %v2796_v6, %v4417_v39  ;;  %v42_v31 = vld [vmem:[#allocation2] sm:$0xff] }
  0x1f   :  { %320 = vmatpush.msra.mxu2 %v2745_v40  ;;  %368 = vmatpush.msra.mxu3 %v2718_v28  ;;  %v4424_v8 = vand.u32 4294901760, %v2827_v41  ;;  %v4425_v1 = vand.u32 4294901760, %v2834_v49  ;;  %v2864_v26 = vand.u32 4294901760, %v42_v31  ;;  %v2902_v34 = vand.u32 4294901760, %v114_v51 }
  0x20   :  { %231 = vmatpush.msra.mxu1 %v230_v61  ;;  %174 = vmatpush.msra.mxu0 %v2737_v35  ;;  %v254_v61 = vand.u32 4294901760, %v253_v36  ;;  %v2862_v36 = vsub.f32 %v135_v43, %v2836_v50  ;;  %v4429_v39 = vand.u32 4294901760, %v2844_v55  ;;  %v4430_v43 = vand.u32 4294901760, %v2849_v62 }
  0x21   :  { %323 = vmatpush.msra.mxu2 %v2757_v46  ;;  %370 = vmatpush.msra.mxu3 %v2737_v35  ;;  %v272_v57 = vand.u32 4294901760, %v271_v7  ;;  %v2888_v7 = vsub.f32 %v42_v31, %v2864_v26  ;;  %v2907_v27 = vand.u32 4294901760, %v107_v42 }
  0x22   :  { %237 = vmatpush.msra.mxu1 %v236_v2  ;;  %176 = vmatpush.msra.mxu0 %v2754_v45  ;;  %v2851_v2 = vand.u32 4294901760, %v128_v56  ;;  %v289_v31 = vsub.f32 %v2849_v62, %v4430_v43 }
  0x23   :  { %326 = vmatpush.msra.mxu2 %v2769_v52  ;;  %372 = vmatpush.msra.mxu3 %v2754_v45  ;;  %v2914_v43 = vand.u32 4294901760, %v2888_v7  ;;  %v2934_v15 = vsub.f32 %v107_v42, %v2907_v27 }
  0x24   :  { %243 = vmatpush.msra.mxu1 %v242_v32  ;;  %178 = vmatpush.msra.mxu0 %v2759_v48  ;;  %v260_v32 = vand.u32 4294901760, %v259_v47  ;;  %v277_v47 = vsub.f32 %v2819_v37, %v4422_v60  ;;  %v2875_v63 = vsub.f32 %v128_v56, %v2851_v2  ;;  %v4431_v56 = vand.u32 4294901760, %v2862_v36 }
  0x25   :  { %329 = vmatpush.msra.mxu2 %v2781_v58  ;;  %374 = vmatpush.msra.mxu3 %v2759_v48  ;;  %v2890_v60 = vand.u32 4294901760, %v121_v12 }
  0x26   :  { %249 = vmatpush.msra.mxu1 %v248_v44  ;;  %180 = vmatpush.msra.mxu0 %v2774_v54  ;;  %v266_v44 = vand.u32 4294901760, %v265_v53  ;;  %v283_v53 = vsub.f32 %v2834_v49, %v4425_v1  ;;  %v4432_v1 = vand.u32 4294901760, %v2875_v63 }
  0x27   :  { %332 = vmatpush.msra.mxu2 %v2784_v59  ;;  %376 = vmatpush.msra.mxu3 %v2774_v54  ;;  %v2917_v14 = vsub.f32 %v121_v12, %v2890_v60 }
  0x28   :  { %255 = vmatpush.msra.mxu1 %v254_v61  ;;  %182 = vmatpush.msra.mxu0 %v2793_v0  ;;  %v540_v61 = vsub.f32 %v2827_v41, %v4424_v8  ;;  %v278_v8 = vand.u32 4294901760, %v277_v47  ;;  %v552_v47 = vsub.f32 %v2862_v36, %v4431_v56  ;;  %v2927_v56 = vsub.f32 %v114_v51, %v2902_v34 }
  0x29   :  { %335 = vmatpush.msra.mxu2 %v2796_v6  ;;  %378 = vmatpush.msra.mxu3 %v2793_v0  ;;  %v4436_v51 = vand.u32 4294901760, %v2917_v14 }
  0x2a   :  { %261 = vmatpush.msra.mxu1 %v260_v32  ;;  %184 = vmatpush.msra.mxu0 %v2805_v13  ;;  %v546_v32 = vsub.f32 %v2844_v55, %v4429_v39  ;;  %v541_v33 = vand.u32 4294901760, %v540_v61  ;;  %v284_v39 = vand.u32 4294901760, %v283_v53  ;;  %v290_v61 = vand.u32 4294901760, %v289_v31 }
  0x2b   :  { %338 = vmatpush.msra.mxu2 %v2819_v37  ;;  %380 = vmatpush.msra.mxu3 %v2805_v13  ;;  %v558_v53 = vsub.f32 %v2875_v63, %v4432_v1  ;;  %v4449_v1 = vand.u32 4294901760, %v2702_v19  ;;  %v4433_v19 = vand.u32 4294901760, %v2934_v15 }
  0x2c   :  { %267 = vmatpush.msra.mxu1 %v266_v44  ;;  %186 = vmatpush.msra.mxu0 %v2810_v30  ;;  %v100_v44 = vld [vmem:[#allocation5 + $0x1c8] sm:$0xff] }
  0x2d   :  { %341 = vmatpush.msra.mxu2 %v2834_v49  ;;  %382 = vmatpush.msra.mxu3 %v2810_v30  ;;  %v2929_v12 = vand.u32 4294901760, %v100_v44 }
  0x2e   :  { %393 = vmatpush.msrb.mxu0 %v198_v22  ;;  %273 = vmatpush.msra.mxu1 %v272_v57  ;;  %v547_v22 = vand.u32 4294901760, %v546_v32  ;;  %v93_v57 = vld [vmem:[#allocation5 + $0x190] sm:$0xff]  ;;  %v190_v32 = vsub.f32 %v2888_v7, %v2914_v43 }
  0x2f   :  { %344 = vmatpush.msra.mxu2 %v2849_v62  ;;  %542 = vmatpush.msrb.mxu3 %v541_v33  ;;  %v2940_v31 = vand.u32 4294901760, %v93_v57  ;;  %v4434_v33 = vand.u32 4294901760, %v2927_v56  ;;  %v2947_v42 = vsub.f32 %v100_v44, %v2929_v12 }
  0x30   :  { %397 = vmatpush.msrb.mxu0 %v204_v23  ;;  %279 = vmatpush.msra.mxu1 %v278_v8  ;;  %v86_v23 = vld [vmem:[#allocation5 + $0x158] sm:$0xff]  ;;  %v553_v8 = vand.u32 4294901760, %v552_v47  ;;  %v4450_v47 = vand.u32 4294901760, %v2705_v20  ;;  %v72_v20 = vld [vmem:[#allocation5 + $0xe8] sm:$0xff] }
  0x31   :  { %497 = vmatpush.msrb.mxu2 %v2807_v18  ;;  %548 = vmatpush.msrb.mxu3 %v547_v22  ;;  %v564_v22 = vsub.f32 %v2917_v14, %v4436_v51  ;;  %v2962_v44 = vsub.f32 %v93_v57, %v2940_v31  ;;  %v51_v51 = vld [vmem:[#allocation5 + $0x40] sm:$0xff] }
  0x32   :  { %401 = vmatpush.msrb.mxu0 %v210_v24  ;;  %285 = vmatpush.msra.mxu1 %v284_v39  ;;  %v559_v24 = vand.u32 4294901760, %v558_v53  ;;  %v2949_v39 = vand.u32 4294901760, %v86_v23  ;;  %v570_v53 = vsub.f32 %v2927_v56, %v4434_v33 }
  0x33   :  { %499 = vmatpush.msrb.mxu2 %v2821_v38  ;;  %554 = vmatpush.msrb.mxu3 %v553_v8  ;;  %v4435_v8 = vand.u32 4294901760, %v2947_v42 }
  0x34   :  { %405 = vmatpush.msrb.mxu0 %v4449_v1  ;;  %291 = vmatpush.msra.mxu1 %v290_v61  ;;  %v2956_v1 = vand.u32 4294901760, %v190_v32  ;;  %v2964_v61 = vand.u32 4294901760, %v79_v16  ;;  %v2975_v57 = vsub.f32 %v86_v23, %v2949_v39  ;;  %v65_v32 = vld [vmem:[#allocation5 + $0xb0] sm:$0xff] }
  0x35   :  { %501 = vmatpush.msrb.mxu2 %v2836_v50  ;;  %560 = vmatpush.msrb.mxu3 %v559_v24  ;;  %v565_v24 = vand.u32 4294901760, %v564_v22  ;;  %v582_v22 = vsub.f32 %v2947_v42, %v4435_v8  ;;  %v3000_v33 = vand.u32 4294901760, %v65_v32 }
  0x36   :  { %460 = vmatpush.msrb.mxu1 %v2676_v3  ;;  %409 = vmatpush.msrb.mxu0 %v4450_v47  ;;  %v4451_v3 = vand.u32 4294901760, %v2708_v21  ;;  %v576_v21 = vsub.f32 %v2934_v15, %v4433_v19  ;;  %v587_v47 = vand.u32 4294901760, %v2962_v44  ;;  %v2989_v23 = vsub.f32 %v79_v16, %v2964_v61 }
  0x37   :  { %503 = vmatpush.msrb.mxu2 %v2851_v2  ;;  %192 = vmatmul.f32.vlgmr.msra.gmra.mxu0 %v2956_v1  ;;  %v593_v19 = vand.u32 4294901760, %v2975_v57 }
  0x38   :  { %462 = vmatpush.msrb.mxu1 %v2678_v4  ;;  %413 = vmatpush.msrb.mxu0 %v4451_v3  ;;  %v4452_v4 = vand.u32 4294901760, %v2721_v29  ;;  %v2986_v3 = vand.u32 4294901760, %v72_v20  ;;  %v58_v29 = vld [vmem:[#allocation5 + $0x78] sm:$0xff]  ;;  %v588_v16 = vsub.f32 %v2962_v44, %v587_v47 }
  0x39   :  { %347 = vmatmul.f32.vlgmr.msra.gmra.mxu2 %v2888_v7  ;;  %386 = vmatmul.f32.vlgmr.msra.gmra.mxu3 %v2914_v43  ;;  %v3013_v8 = vand.u32 4294901760, %v58_v29 }
  0x3a   :  { %464 = vmatpush.msrb.mxu1 %v2680_v5  ;;  %417 = vmatpush.msrb.mxu0 %v4452_v4  ;;  %v4453_v5 = vand.u32 4294901760, %v2745_v40  ;;  %v571_v4 = vand.u32 4294901760, %v570_v53  ;;  %v577_v40 = vand.u32 4294901760, %v576_v21  ;;  %v599_v53 = vand.u32 4294901760, %v2989_v23 }
  0x3b   :  { %505 = vmatpush.msrb.mxu2 %v2890_v60  ;;  %566 = vmatpush.msrb.mxu3 %v565_v24  ;;  %v594_v21 = vsub.f32 %v2975_v57, %v593_v19  ;;  %v3023_v24 = vsub.f32 %v65_v32, %v3000_v33  ;;  %v3036_v32 = vsub.f32 %v58_v29, %v3013_v8 }
  0x3c   :  { %466 = vmatpush.msrb.mxu1 %v2682_v9  ;;  %421 = vmatpush.msrb.mxu0 %v4453_v5  ;;  %v4454_v9 = vand.u32 4294901760, %v2757_v46  ;;  %v3011_v5 = vsub.f32 %v72_v20, %v2986_v3  ;;  %v583_v46 = vand.u32 4294901760, %v582_v22  ;;  %v44_v20 = vld [vmem:[#allocation5 + $0x8] sm:$0xff] }
  0x3d   :  { %507 = vmatpush.msrb.mxu2 %v2902_v34  ;;  %293 = vmatmul.f32.vlgmr.msra.gmra.mxu1 %v2864_v26 }
  0x3e   :  { %468 = vmatpush.msrb.mxu1 %v2684_v10  ;;  %425 = vmatpush.msrb.mxu0 %v4454_v9  ;;  %v4455_v10 = vand.u32 4294901760, %v2769_v52  ;;  %v4456_v9 = vand.u32 4294901760, %v2781_v58  ;;  %v589_v52 = vand.u32 4294901760, %v588_v16  ;;  %v605_v22 = vand.u32 4294901760, %v3011_v5 }
  0x3f   :  { %509 = vmatpush.msrb.mxu2 %v2907_v27  ;;  %572 = vmatpush.msrb.mxu3 %v571_v4  ;;  %v600_v4 = vsub.f32 %v2989_v23, %v599_v53  ;;  %v3041_v58 = vand.u32 4294901760, %v44_v20  ;;  %v611_v16 = vand.u32 4294901760, %v3023_v24 }
  0x40   :  { %470 = vmatpush.msrb.mxu1 %v2686_v11  ;;  %429 = vmatpush.msrb.mxu0 %v4455_v10  ;;  %v3028_v11 = vand.u32 4294901760, %v51_v51  ;;  %v4458_v10 = vand.u32 4294901760, %v2796_v6 }
  0x41   :  { %511 = vmatpush.msrb.mxu2 %v2929_v12  ;;  %578 = vmatpush.msrb.mxu3 %v577_v40  ;;  %v595_v40 = vand.u32 4294901760, %v594_v21  ;;  %v3060_v6 = vsub.f32 %v44_v20, %v3041_v58  ;;  %v4460_v21 = vand.u32 4294901760, %v2834_v49 }
  0x42   :  { %472 = vmatpush.msrb.mxu1 %v2698_v17  ;;  %433 = vmatpush.msrb.mxu0 %v4456_v9  ;;  %v4457_v17 = vand.u32 4294901760, %v2784_v59  ;;  %v3049_v29 = vsub.f32 %v51_v51, %v3028_v11  ;;  %v606_v59 = vsub.f32 %v3011_v5, %v605_v22  ;;  %v612_v51 = vsub.f32 %v3023_v24, %v611_v16 }
  0x43   :  { %513 = vmatpush.msrb.mxu2 %v2940_v31  ;;  %584 = vmatpush.msrb.mxu3 %v583_v46  ;;  %v617_v46 = vand.u32 4294901760, %v3036_v32  ;;  %v4461_v9 = vand.u32 4294901760, %v2849_v62 }
  0x44   :  { %474 = vmatpush.msrb.mxu1 %v2714_v25  ;;  %437 = vmatpush.msrb.mxu0 %v4457_v17  ;;  %v601_v25 = vand.u32 4294901760, %v600_v4  ;;  %v613_v49 = vand.u32 4294901760, %v612_v51  ;;  %v4464_v4 = vand.u32 4294901760, %v2862_v36  ;;  %v4465_v17 = vand.u32 4294901760, %v2875_v63 }
  0x45   :  { %515 = vmatpush.msrb.mxu2 %v2949_v39  ;;  %590 = vmatpush.msrb.mxu3 %v589_v52  ;;  %v618_v20 = vsub.f32 %v3036_v32, %v617_v46 }
  0x46   :  { %476 = vmatpush.msrb.mxu1 %v2718_v28  ;;  %441 = vmatpush.msrb.mxu0 %v4458_v10  ;;  %v4459_v28 = vand.u32 4294901760, %v2819_v37  ;;  %v607_v37 = vand.u32 4294901760, %v606_v59 }
  0x47   :  { %517 = vmatpush.msrb.mxu2 %v2964_v61  ;;  %596 = vmatpush.msrb.mxu3 %v595_v40  ;;  %v4468_v40 = vand.u32 4294901760, %v2934_v15 }
  0x48   :  { %478 = vmatpush.msrb.mxu1 %v2737_v35  ;;  %445 = vmatpush.msrb.mxu0 %v4459_v28  ;;  %v623_v35 = vand.u32 4294901760, %v3049_v29  ;;  %v108_v28 = vld [vmem:[#allocation5 + $0x208] sm:$0xff] }
  0x49   :  { %519 = vmatpush.msrb.mxu2 %v2986_v3  ;;  %602 = vmatpush.msrb.mxu3 %v601_v25 }
  0x4a   :  { %480 = vmatpush.msrb.mxu1 %v2754_v45  ;;  %449 = vmatpush.msrb.mxu0 %v4460_v21  ;;  %v629_v45 = vand.u32 4294901760, %v3060_v6  ;;  %v624_v52 = vsub.f32 %v3049_v29, %v623_v35  ;;  %v3177_v21 = vand.u32 4294901760, %v108_v28 }
  0x4b   :  { %521 = vmatpush.msrb.mxu2 %v3000_v33  ;;  %608 = vmatpush.msrb.mxu3 %v607_v37 }
  0x4c   :  { %482 = vmatpush.msrb.mxu1 %v2759_v48  ;;  %453 = vmatpush.msrb.mxu0 %v4461_v9  ;;  %v619_v48 = vand.u32 4294901760, %v618_v20  ;;  %v630_v62 = vsub.f32 %v3060_v6, %v629_v45  ;;  %v94_v20 = vld [vmem:[#allocation5 + $0x198] sm:$0xff] }
  0x4d   :  { %455 = vmatmul.f32.vlgmr.msrb.gmra.mxu0 %v2864_v26  ;;  %523 = vmatpush.msrb.mxu2 %v3013_v8 }
  0x4e   :  { %640 = vmatpush.msra.mxu0 %v2827_v41  ;;  %484 = vmatpush.msrb.mxu1 %v2774_v54  ;;  %v625_v54 = vand.u32 4294901760, %v624_v52 }
  0x4f   :  { %614 = vmatpush.msrb.mxu3 %v613_v49  ;;  %525 = vmatpush.msrb.mxu2 %v3028_v11 }
  0x50   :  { %643 = vmatpush.msra.mxu0 %v2844_v55  ;;  %486 = vmatpush.msrb.mxu1 %v2793_v0  ;;  %v631_v0 = vand.u32 4294901760, %v630_v62  ;;  %v80_v62 = vld [vmem:[#allocation5 + $0x128] sm:$0xff] }
  0x51   :  { %620 = vmatpush.msrb.mxu3 %v619_v48  ;;  %527 = vmatpush.msrb.mxu2 %v3041_v58 }
  0x52   :  { %646 = vmatpush.msra.mxu0 %v2862_v36  ;;  %488 = vmatpush.msrb.mxu1 %v2805_v13  ;;  %v4462_v13 = vand.u32 4294901760, %v2827_v41  ;;  %v150_v41 = vld [vmem:[#allocation5 + $0x358] sm:$0xff]  ;;  %v4467_v36 = vand.u32 4294901760, %v2927_v56 }
  0x53   :  { %626 = vmatpush.msrb.mxu3 %v625_v54  ;;  %533 = vmatmul.f32.vlgmr.msrb.gmra.mxu2 %v2956_v1 }
  0x54   :  { %649 = vmatpush.msra.mxu0 %v2875_v63  ;;  %490 = vmatpush.msrb.mxu1 %v2810_v30  ;;  %v4463_v30 = vand.u32 4294901760, %v2844_v55  ;;  %v4466_v55 = vand.u32 4294901760, %v2917_v14  ;;  %v136_v63 = vld [vmem:[#allocation5 + $0x2e8] sm:$0xff] }
  0x55   :  { %492 = vmatmul.f32.vlgmr.msrb.gmra.mxu1 %v2864_v26  ;;  %734 = vmatpush.msra.mxu2 %v4462_v13  ;;  %v3141_v10 = vand.u32 4294901760, %v136_v63  ;;  %v73_v13 = vld [vmem:[#allocation5 + $0xf0] sm:$0xff] }
  0x56   :  { %693 = vmatpush.msra.mxu1 %v2807_v18  ;;  %652 = vmatpush.msra.mxu0 %v2917_v14  ;;  %v129_v14 = vld [vmem:[#allocation5 + $0x2b0] sm:$0xff] }
  0x57   :  { %632 = vmatpush.msrb.mxu3 %v631_v0  ;;  %738 = vmatpush.msra.mxu2 %v4463_v30  ;;  %v3148_v25 = vand.u32 4294901760, %v129_v14 }
  0x58   :  { %695 = vmatpush.msra.mxu1 %v2821_v38  ;;  %655 = vmatpush.msra.mxu0 %v2927_v56  ;;  %v4469_v56 = vand.u32 4294901760, %v2947_v42 }
  0x59   :  { %801 = vmatpush.msra.mxu3 %v2807_v18  ;;  %742 = vmatpush.msra.mxu2 %v4464_v4  ;;  %v143_v18 = vld [vmem:[#allocation5 + $0x320] sm:$0xff] }
  0x5a   :  { %697 = vmatpush.msra.mxu1 %v2836_v50  ;;  %658 = vmatpush.msra.mxu0 %v2934_v15 }
  0x5b   :  { %803 = vmatpush.msra.mxu3 %v2821_v38  ;;  %746 = vmatpush.msra.mxu2 %v4465_v17  ;;  %v3124_v38 = vand.u32 4294901760, %v150_v41 }
  0x5c   :  { %699 = vmatpush.msra.mxu1 %v2851_v2  ;;  %661 = vmatpush.msra.mxu0 %v2947_v42 }
  0x5d   :  { %805 = vmatpush.msra.mxu3 %v2836_v50  ;;  %750 = vmatpush.msra.mxu2 %v4466_v55  ;;  %v3131_v50 = vand.u32 4294901760, %v143_v18  ;;  %v3251_v55 = vand.u32 4294901760, %v73_v13 }
  0x5e   :  { %701 = vmatpush.msra.mxu1 %v2890_v60  ;;  %664 = vmatpush.msra.mxu0 %v2962_v44 }
  0x5f   :  { %807 = vmatpush.msra.mxu3 %v2851_v2  ;;  %754 = vmatpush.msra.mxu2 %v4467_v36  ;;  %v3136_v2 = vsub.f32 %v150_v41, %v3124_v38  ;;  %v3151_v59 = vsub.f32 %v143_v18, %v3131_v50  ;;  %v3238_v41 = vand.u32 4294901760, %v80_v62 }
  0x60   :  { %703 = vmatpush.msra.mxu1 %v2902_v34  ;;  %667 = vmatpush.msra.mxu0 %v2975_v57 }
  0x61   :  { %809 = vmatpush.msra.mxu3 %v2890_v60  ;;  %758 = vmatpush.msra.mxu2 %v4468_v40  ;;  %v122_v60 = vld [vmem:[#allocation5 + $0x278] sm:$0xff]  ;;  %v880_v15 = vand.u32 4294901760, %v3136_v2  ;;  %v886_v51 = vand.u32 4294901760, %v3151_v59  ;;  %v3267_v40 = vsub.f32 %v80_v62, %v3238_v41 }
  0x62   :  { %705 = vmatpush.msra.mxu1 %v2907_v27  ;;  %670 = vmatpush.msra.mxu0 %v2989_v23  ;;  %v3159_v42 = vand.u32 4294901760, %v122_v60 }
  0x63   :  { %811 = vmatpush.msra.mxu3 %v2902_v34  ;;  %762 = vmatpush.msra.mxu2 %v4469_v56  ;;  %v115_v34 = vld [vmem:[#allocation5 + $0x240] sm:$0xff]  ;;  %v887_v9 = vsub.f32 %v3151_v59, %v886_v51 }
  0x64   :  { %707 = vmatpush.msra.mxu1 %v2929_v12  ;;  %673 = vmatpush.msra.mxu0 %v3011_v5  ;;  %v3170_v44 = vand.u32 4294901760, %v115_v34  ;;  %v3187_v57 = vsub.f32 %v122_v60, %v3159_v42 }
  0x65   :  { %813 = vmatpush.msra.mxu3 %v2907_v27  ;;  %766 = vmatpush.msra.mxu2 %v587_v47  ;;  %v3162_v27 = vsub.f32 %v136_v63, %v3141_v10  ;;  %v101_v47 = vld [vmem:[#allocation5 + $0x1d0] sm:$0xff]  ;;  %v888_v54 = vand.u32 4294901760, %v887_v9 }
  0x66   :  { %709 = vmatpush.msra.mxu1 %v2940_v31  ;;  %676 = vmatpush.msra.mxu0 %v3023_v24  ;;  %v3191_v37 = vand.u32 4294901760, %v101_v47  ;;  %v3201_v23 = vsub.f32 %v115_v34, %v3170_v44  ;;  %v904_v5 = vand.u32 4294901760, %v3187_v57  ;;  %v3279_v34 = vsub.f32 %v73_v13, %v3251_v55 }
  0x67   :  { %815 = vmatpush.msra.mxu3 %v2929_v12  ;;  %770 = vmatpush.msra.mxu2 %v593_v19  ;;  %v3173_v12 = vsub.f32 %v129_v14, %v3148_v25  ;;  %v881_v19 = vsub.f32 %v3136_v2, %v880_v15 }
  0x68   :  { %711 = vmatpush.msra.mxu1 %v2949_v39  ;;  %679 = vmatpush.msra.mxu0 %v3036_v32  ;;  %v910_v24 = vand.u32 4294901760, %v3201_v23  ;;  %v905_v4 = vsub.f32 %v3187_v57, %v904_v5 }
  0x69   :  { %817 = vmatpush.msra.mxu3 %v2940_v31  ;;  %v892_v31 = vand.u32 4294901760, %v3162_v27  ;;  %774 = vmatpush.msra.mxu2 %v599_v53  ;;  %v898_v49 = vand.u32 4294901760, %v3173_v12  ;;  %v87_v53 = vld [vmem:[#allocation5 + $0x160] sm:$0xff]  ;;  %v882_v52 = vand.u32 4294901760, %v881_v19  ;;  %v940_v19 = vand.u32 4294901760, %v3267_v40 }
  0x6a   :  { %713 = vmatpush.msra.mxu1 %v2964_v61  ;;  %682 = vmatpush.msra.mxu0 %v3049_v29  ;;  %v911_v18 = vsub.f32 %v3201_v23, %v910_v24  ;;  %v59_v29 = vld [vmem:[#allocation5 + $0x80] sm:$0xff] }
  0x6b   :  { %819 = vmatpush.msra.mxu3 %v2949_v39  ;;  %778 = vmatpush.msra.mxu2 %v605_v22  ;;  %v3206_v39 = vsub.f32 %v108_v28, %v3177_v21  ;;  %v893_v48 = vsub.f32 %v3162_v27, %v892_v31  ;;  %v3215_v22 = vand.u32 4294901760, %v94_v20  ;;  %v899_v0 = vsub.f32 %v3173_v12, %v898_v49 }
  0x6c   :  { %715 = vmatpush.msra.mxu1 %v2986_v3  ;;  %685 = vmatpush.msra.mxu0 %v3060_v6  ;;  %v912_v6 = vand.u32 4294901760, %v911_v18  ;;  %v3276_v56 = vand.u32 4294901760, %v59_v29  ;;  %v941_v13 = vsub.f32 %v3267_v40, %v940_v19 }
  0x6d   :  { %821 = vmatpush.msra.mxu3 %v2964_v61  ;;  %782 = vmatpush.msra.mxu2 %v611_v16  ;;  %v3220_v61 = vsub.f32 %v101_v47, %v3191_v37  ;;  %v3229_v16 = vand.u32 4294901760, %v87_v53  ;;  %v894_v30 = vand.u32 4294901760, %v893_v48  ;;  %v3241_v32 = vsub.f32 %v94_v20, %v3215_v22  ;;  %v45_v47 = vld [vmem:[#allocation5 + $0x10] sm:$0xff] }
  0x6e   :  { %838 = vmatpush.msrb.mxu0 %v3124_v38  ;;  %717 = vmatpush.msra.mxu1 %v3000_v33  ;;  %v900_v17 = vand.u32 4294901760, %v899_v0  ;;  %v946_v48 = vand.u32 4294901760, %v3279_v34  ;;  %v3300_v62 = vand.u32 4294901760, %v45_v47 }
  0x6f   :  { %823 = vmatpush.msra.mxu3 %v2986_v3  ;;  %786 = vmatpush.msra.mxu2 %v617_v46  ;;  %v916_v3 = vand.u32 4294901760, %v3206_v39  ;;  %v66_v46 = vld [vmem:[#allocation5 + $0xb8] sm:$0xff]  ;;  %v3254_v63 = vsub.f32 %v87_v53, %v3229_v16  ;;  %v928_v36 = vand.u32 4294901760, %v3241_v32 }
  0x70   :  { %840 = vmatpush.msrb.mxu0 %v3131_v50  ;;  %719 = vmatpush.msra.mxu1 %v3013_v8  ;;  %v3264_v14 = vand.u32 4294901760, %v66_v46 }
  0x71   :  { %825 = vmatpush.msra.mxu3 %v3000_v33  ;;  %790 = vmatpush.msra.mxu2 %v623_v35  ;;  %v922_v33 = vand.u32 4294901760, %v3220_v61  ;;  %v906_v35 = vand.u32 4294901760, %v905_v4 }
  0x72   :  { %842 = vmatpush.msrb.mxu0 %v3141_v10  ;;  %721 = vmatpush.msra.mxu1 %v3028_v11  ;;  %v3291_v9 = vsub.f32 %v66_v46, %v3264_v14 }
  0x73   :  { %827 = vmatpush.msra.mxu3 %v3013_v8  ;;  %v917_v8 = vsub.f32 %v3206_v39, %v916_v3  ;;  %794 = vmatpush.msra.mxu2 %v629_v45  ;;  %v923_v60 = vsub.f32 %v3220_v61, %v922_v33  ;;  %v934_v45 = vand.u32 4294901760, %v3254_v63 }
  0x74   :  { %844 = vmatpush.msrb.mxu0 %v3148_v25  ;;  %723 = vmatpush.msra.mxu1 %v3041_v58 }
  0x75   :  { %829 = vmatpush.msra.mxu3 %v3028_v11  ;;  %v52_v11 = vld [vmem:[#allocation5 + $0x48] sm:$0xff]  ;;  %v918_v28 = vand.u32 4294901760, %v917_v8  ;;  %981 = vmatpush.msrb.mxu2 %v3136_v2  ;;  %v924_v53 = vand.u32 4294901760, %v923_v60  ;;  %v3323_v8 = vsub.f32 %v45_v47, %v3300_v62  ;;  %v137_v2 = vld [vmem:[#allocation5 + $0x2f0] sm:$0xff] }
  0x76   :  { %883 = vmatpush.msrb.mxu1 %v882_v52  ;;  %846 = vmatpush.msrb.mxu0 %v3159_v42  ;;  %v3288_v20 = vand.u32 4294901760, %v52_v11  ;;  %v935_v52 = vsub.f32 %v3254_v63, %v934_v45 }
  0x77   :  { %831 = vmatpush.msra.mxu3 %v3041_v58  ;;  %v929_v58 = vsub.f32 %v3241_v32, %v928_v36  ;;  %984 = vmatpush.msrb.mxu2 %v3151_v59 }
  0x78   :  { %889 = vmatpush.msrb.mxu1 %v888_v54  ;;  %848 = vmatpush.msrb.mxu0 %v3170_v44  ;;  %v3303_v54 = vsub.f32 %v59_v29, %v3276_v56  ;;  %v3313_v4 = vsub.f32 %v52_v11, %v3288_v20  ;;  %v936_v46 = vand.u32 4294901760, %v935_v52  ;;  %v942_v29 = vand.u32 4294901760, %v941_v13 }
  0x79   :  { %634 = vmatmul.f32.vlgmr.msrb.gmra.mxu3 %v2864_v26  ;;  %987 = vmatpush.msrb.mxu2 %v3162_v27  ;;  %v930_v0 = vand.u32 4294901760, %v929_v58 }
  0x7a   :  { %895 = vmatpush.msrb.mxu1 %v894_v30  ;;  %850 = vmatpush.msrb.mxu0 %v3177_v21  ;;  %v952_v30 = vand.u32 4294901760, %v3291_v9  ;;  %v958_v18 = vand.u32 4294901760, %v3303_v54  ;;  %v964_v60 = vand.u32 4294901760, %v3313_v4 }
  0x7b   :  { %1034 = vmatpush.msrb.mxu3 %v3124_v38  ;;  %990 = vmatpush.msrb.mxu2 %v3173_v12 }
  0x7c   :  { %901 = vmatpush.msrb.mxu1 %v900_v17  ;;  %852 = vmatpush.msrb.mxu0 %v3191_v37  ;;  %v947_v17 = vsub.f32 %v3279_v34, %v946_v48  ;;  %v965_v58 = vsub.f32 %v3313_v4, %v964_v60 }
  0x7d   :  { %1036 = vmatpush.msrb.mxu3 %v3131_v50  ;;  %796 = vmatmul.f32.vlgmr.msra.gmra.mxu2 %v2864_v26 }
  0x7e   :  { %907 = vmatpush.msrb.mxu1 %v906_v35  ;;  %854 = vmatpush.msrb.mxu0 %v3215_v22  ;;  %v953_v35 = vsub.f32 %v3291_v9, %v952_v30  ;;  %v948_v11 = vand.u32 4294901760, %v947_v17  ;;  %v966_v13 = vand.u32 4294901760, %v965_v58 }
  0x7f   :  { %1038 = vmatpush.msrb.mxu3 %v3141_v10  ;;  %993 = vmatpush.msrb.mxu2 %v3187_v57 }
  0x80   :  { %913 = vmatpush.msrb.mxu1 %v912_v6  ;;  %856 = vmatpush.msrb.mxu0 %v3229_v16  ;;  %v959_v6 = vsub.f32 %v3303_v54, %v958_v18  ;;  %v954_v47 = vand.u32 4294901760, %v953_v35 }
  0x81   :  { %1040 = vmatpush.msrb.mxu3 %v3148_v25  ;;  %688 = vmatmul.f32.vlgmr.msra.gmra.mxu0 %v2888_v7 }
  0x82   :  { %919 = vmatpush.msrb.mxu1 %v918_v28  ;;  %858 = vmatpush.msrb.mxu0 %v3238_v41  ;;  %v970_v28 = vand.u32 4294901760, %v3323_v8 }
  0x83   :  { %833 = vmatmul.f32.vlgmr.msra.gmra.mxu3 %v2864_v26  ;;  %996 = vmatpush.msrb.mxu2 %v3201_v23 }
  0x84   :  { %925 = vmatpush.msrb.mxu1 %v924_v53  ;;  %860 = vmatpush.msrb.mxu0 %v3251_v55  ;;  %v960_v53 = vand.u32 4294901760, %v959_v6  ;;  %v971_v52 = vsub.f32 %v3323_v8, %v970_v28 }
  0x85   :  { %1042 = vmatpush.msrb.mxu3 %v3159_v42  ;;  %727 = vmatmul.f32.vlgmr.msra.gmra.mxu1 %v2914_v43 }
  0x86   :  { %931 = vmatpush.msrb.mxu1 %v930_v0  ;;  %862 = vmatpush.msrb.mxu0 %v3264_v14  ;;  %v151_v0 = vld [vmem:[#allocation5 + $0x360] sm:$0xff]  ;;  %v972_v17 = vand.u32 4294901760, %v971_v52 }
  0x87   :  { %999 = vmatpush.msrb.mxu2 %v3206_v39  ;;  %1044 = vmatpush.msrb.mxu3 %v3170_v44 }
  0x88   :  { %937 = vmatpush.msrb.mxu1 %v936_v46  ;;  %864 = vmatpush.msrb.mxu0 %v3276_v56  ;;  %v144_v46 = vld [vmem:[#allocation5 + $0x328] sm:$0xff] }
  0x89   :  { %1002 = vmatpush.msrb.mxu2 %v3220_v61  ;;  %1046 = vmatpush.msrb.mxu3 %v3177_v21  ;;  %v3365_v59 = vand.u32 4294901760, %v144_v46 }
  0x8a   :  { %943 = vmatpush.msrb.mxu1 %v942_v29  ;;  %866 = vmatpush.msrb.mxu0 %v3288_v20  ;;  %v3359_v29 = vand.u32 4294901760, %v151_v0 }
  0x8b   :  { %1005 = vmatpush.msrb.mxu2 %v3241_v32  ;;  %1048 = vmatpush.msrb.mxu3 %v3191_v37  ;;  %v3382_v12 = vsub.f32 %v144_v46, %v3365_v59 }
  0x8c   :  { %949 = vmatpush.msrb.mxu1 %v948_v11  ;;  %868 = vmatpush.msrb.mxu0 %v3300_v62  ;;  %v3372_v27 = vsub.f32 %v151_v0, %v3359_v29  ;;  %v102_v11 = vld [vmem:[#allocation5 + $0x1d8] sm:$0xff] }
  0x8d   :  { %1008 = vmatpush.msrb.mxu2 %v3254_v63  ;;  %1050 = vmatpush.msrb.mxu3 %v3215_v22  ;;  %v3445_v63 = vand.u32 4294901760, %v102_v11 }
  0x8e   :  { %1075 = vmatpush.msra.mxu0 %v880_v15  ;;  %955 = vmatpush.msrb.mxu1 %v954_v47  ;;  %v130_v15 = vld [vmem:[#allocation5 + $0x2b8] sm:$0xff] }
  0x8f   :  { %1011 = vmatpush.msrb.mxu2 %v3267_v40  ;;  %1052 = vmatpush.msrb.mxu3 %v3229_v16 }
  0x90   :  { %1079 = vmatpush.msra.mxu0 %v886_v51  ;;  %961 = vmatpush.msrb.mxu1 %v960_v53  ;;  %v3374_v51 = vand.u32 4294901760, %v137_v2 }
  0x91   :  { %1014 = vmatpush.msrb.mxu2 %v3279_v34  ;;  %1054 = vmatpush.msrb.mxu3 %v3238_v41  ;;  %v3467_v34 = vsub.f32 %v102_v11, %v3445_v63  ;;  %v46_v11 = vld [vmem:[#allocation5 + $0x18] sm:$0xff] }
  0x92   :  { %1083 = vmatpush.msra.mxu0 %v892_v31  ;;  %967 = vmatpush.msrb.mxu1 %v966_v13  ;;  %v3384_v31 = vand.u32 4294901760, %v130_v15  ;;  %v3393_v57 = vsub.f32 %v137_v2, %v3374_v51 }
  0x93   :  { %1017 = vmatpush.msrb.mxu2 %v3291_v9  ;;  %1056 = vmatpush.msrb.mxu3 %v3251_v55  ;;  %v74_v9 = vld [vmem:[#allocation5 + $0xf8] sm:$0xff] }
  0x94   :  { %1087 = vmatpush.msra.mxu0 %v898_v49  ;;  %973 = vmatpush.msrb.mxu1 %v972_v17  ;;  %v123_v49 = vld [vmem:[#allocation5 + $0x280] sm:$0xff]  ;;  %v1233_v39 = vand.u32 4294901760, %v3393_v57 }
  0x95   :  { %v3401_v23 = vand.u32 4294901760, %v123_v49  ;;  %1020 = vmatpush.msrb.mxu2 %v3303_v54  ;;  %1058 = vmatpush.msrb.mxu3 %v3264_v14  ;;  %v1263_v54 = vand.u32 4294901760, %v3467_v34 }
  0x96   :  { %1142 = vmatpush.msra.mxu1 %v3124_v38  ;;  %1091 = vmatpush.msra.mxu0 %v904_v5  ;;  %v1221_v38 = vand.u32 4294901760, %v3372_v27  ;;  %v3404_v5 = vsub.f32 %v130_v15, %v3384_v31  ;;  %v3496_v15 = vand.u32 4294901760, %v74_v9 }
  0x97   :  { %1023 = vmatpush.msrb.mxu2 %v3313_v4  ;;  %1060 = vmatpush.msrb.mxu3 %v3276_v56  ;;  %v3427_v35 = vsub.f32 %v123_v49, %v3401_v23  ;;  %v60_v4 = vld [vmem:[#allocation5 + $0x88] sm:$0xff] }
  0x98   :  { %1144 = vmatpush.msra.mxu1 %v3131_v50  ;;  %1095 = vmatpush.msra.mxu0 %v910_v24  ;;  %v1227_v50 = vand.u32 4294901760, %v3382_v12  ;;  %v116_v24 = vld [vmem:[#allocation5 + $0x248] sm:$0xff] }
  0x99   :  { %1026 = vmatpush.msrb.mxu2 %v3323_v8  ;;  %1062 = vmatpush.msrb.mxu3 %v3288_v20  ;;  %v53_v8 = vld [vmem:[#allocation5 + $0x50] sm:$0xff] }
  0x9a   :  { %1146 = vmatpush.msra.mxu1 %v3141_v10  ;;  %1099 = vmatpush.msra.mxu0 %v916_v3  ;;  %v1222_v10 = vsub.f32 %v3372_v27, %v1221_v38  ;;  %v109_v3 = vld [vmem:[#allocation5 + $0x210] sm:$0xff]  ;;  %v1228_v61 = vsub.f32 %v3382_v12, %v1227_v50 }
  0x9b   :  { %1179 = vmatpush.msra.mxu2 %v3359_v29  ;;  %1064 = vmatpush.msrb.mxu3 %v3300_v62 }
  0x9c   :  { %1148 = vmatpush.msra.mxu1 %v3148_v25  ;;  %1103 = vmatpush.msra.mxu0 %v922_v33  ;;  %v3418_v25 = vand.u32 4294901760, %v116_v24  ;;  %v1239_v33 = vand.u32 4294901760, %v3404_v5  ;;  %v1223_v32 = vand.u32 4294901760, %v1222_v10  ;;  %v1229_v6 = vand.u32 4294901760, %v1228_v61 }
  0x9d   :  { %1181 = vmatpush.msra.mxu2 %v3365_v59  ;;  %1068 = vmatmul.f32.vlgmr.msrb.gmra.mxu3 %v2914_v43  ;;  %v1264_v10 = vsub.f32 %v3467_v34, %v1263_v54  ;;  %v3522_v61 = vand.u32 4294901760, %v60_v4 }
  0x9e   :  { %1150 = vmatpush.msra.mxu1 %v3159_v42  ;;  %1107 = vmatpush.msra.mxu0 %v928_v36  ;;  %v3432_v42 = vand.u32 4294901760, %v109_v3  ;;  %v1234_v36 = vsub.f32 %v3393_v57, %v1233_v39  ;;  %v1240_v47 = vsub.f32 %v3404_v5, %v1239_v33 }
  0x9f   :  { %1224 = vmatpush.msra.mxu3 %v1223_v32  ;;  %1183 = vmatpush.msra.mxu2 %v3374_v51 }
  0xa0   :  { %1152 = vmatpush.msra.mxu1 %v3170_v44  ;;  %1111 = vmatpush.msra.mxu0 %v934_v45  ;;  %v3443_v44 = vsub.f32 %v116_v24, %v3418_v25  ;;  %v95_v45 = vld [vmem:[#allocation5 + $0x1a0] sm:$0xff]  ;;  %v3457_v40 = vsub.f32 %v109_v3, %v3432_v42  ;;  %v1235_v58 = vand.u32 4294901760, %v1234_v36  ;;  %v1241_v52 = vand.u32 4294901760, %v1240_v47 }
  0xa1   :  { %v3460_v53 = vand.u32 4294901760, %v95_v45  ;;  %1230 = vmatpush.msra.mxu3 %v1229_v6  ;;  %1185 = vmatpush.msra.mxu2 %v3384_v31  ;;  %v3520_v3 = vsub.f32 %v74_v9, %v3496_v15  ;;  %v3535_v6 = vand.u32 4294901760, %v53_v8 }
  0xa2   :  { %1154 = vmatpush.msra.mxu1 %v3177_v21  ;;  %1115 = vmatpush.msra.mxu0 %v940_v19  ;;  %v1245_v21 = vand.u32 4294901760, %v3427_v35  ;;  %v88_v19 = vld [vmem:[#allocation5 + $0x168] sm:$0xff] }
  0xa3   :  { %v3473_v13 = vand.u32 4294901760, %v88_v19  ;;  %1236 = vmatpush.msra.mxu3 %v1235_v58  ;;  %1029 = vmatmul.f32.vlgmr.msrb.gmra.mxu2 %v2888_v7  ;;  %v3545_v58 = vsub.f32 %v60_v4, %v3522_v61  ;;  %v3557_v9 = vsub.f32 %v53_v8, %v3535_v6 }
  0xa4   :  { %1156 = vmatpush.msra.mxu1 %v3191_v37  ;;  %1119 = vmatpush.msra.mxu0 %v946_v48  ;;  %v1251_v37 = vand.u32 4294901760, %v3443_v44  ;;  %v81_v48 = vld [vmem:[#allocation5 + $0x130] sm:$0xff]  ;;  %v1246_v0 = vsub.f32 %v3427_v35, %v1245_v21 }
  0xa5   :  { %v3483_v46 = vand.u32 4294901760, %v81_v48  ;;  %1242 = vmatpush.msra.mxu3 %v1241_v52  ;;  %v3494_v2 = vsub.f32 %v88_v19, %v3473_v13  ;;  %1187 = vmatpush.msra.mxu2 %v3401_v23  ;;  %v1287_v19 = vand.u32 4294901760, %v3520_v3 }
  0xa6   :  { %1158 = vmatpush.msra.mxu1 %v3215_v22  ;;  %1123 = vmatpush.msra.mxu0 %v952_v30  ;;  %v1257_v22 = vand.u32 4294901760, %v3457_v40  ;;  %v3481_v30 = vsub.f32 %v95_v45, %v3460_v53  ;;  %v1247_v17 = vand.u32 4294901760, %v1246_v0 }
  0xa7   :  { %v3508_v49 = vsub.f32 %v81_v48, %v3483_v46  ;;  %874 = vmatmul.f32.vlgmr.msrb.gmra.mxu0 %v2956_v1  ;;  %1189 = vmatpush.msra.mxu2 %v3418_v25  ;;  %v3547_v48 = vand.u32 4294901760, %v46_v11 }
  0xa8   :  { %1160 = vmatpush.msra.mxu1 %v3229_v16  ;;  %1127 = vmatpush.msra.mxu0 %v958_v18  ;;  %v1252_v16 = vsub.f32 %v3443_v44, %v1251_v37  ;;  %v67_v18 = vld [vmem:[#allocation5 + $0xc0] sm:$0xff] }
  0xa9   :  { %v3510_v24 = vand.u32 4294901760, %v67_v18  ;;  %1248 = vmatpush.msra.mxu3 %v1247_v17  ;;  %975 = vmatmul.f32.vlgmr.msrb.gmra.mxu1 %v2864_v26  ;;  %v1281_v36 = vand.u32 4294901760, %v3508_v49  ;;  %v3567_v17 = vsub.f32 %v46_v11, %v3547_v48 }
  0xaa   :  { %1162 = vmatpush.msra.mxu1 %v3238_v41  ;;  %1131 = vmatpush.msra.mxu0 %v964_v60  ;;  %v1258_v41 = vsub.f32 %v3457_v40, %v1257_v22  ;;  %v1269_v60 = vand.u32 4294901760, %v3481_v30 }
  0xab   :  { %1191 = vmatpush.msra.mxu2 %v3432_v42  ;;  %v3533_v45 = vsub.f32 %v67_v18, %v3510_v24  ;;  %v1282_v52 = vsub.f32 %v3508_v49, %v1281_v36  ;;  %v4439_v18 = vand.u32 4294901760, %v3545_v58 }
  0xac   :  { %1164 = vmatpush.msra.mxu1 %v3251_v55  ;;  %1135 = vmatpush.msra.mxu0 %v970_v28  ;;  %v1253_v55 = vand.u32 4294901760, %v1252_v16  ;;  %v1275_v28 = vand.u32 4294901760, %v3494_v2  ;;  %v1270_v32 = vsub.f32 %v3481_v30, %v1269_v60  ;;  %v1288_v16 = vsub.f32 %v3520_v3, %v1287_v19 }
  0xad   :  { %1193 = vmatpush.msra.mxu2 %v3445_v63  ;;  %v4440_v0 = vand.u32 4294901760, %v3533_v45  ;;  %v1300_v8 = vsub.f32 %v3545_v58, %v4439_v18 }
  0xae   :  { %1166 = vmatpush.msra.mxu1 %v3264_v14  ;;  %1322 = vmatpush.msrb.mxu0 %v3372_v27  ;;  %v1259_v14 = vand.u32 4294901760, %v1258_v41  ;;  %v1276_v47 = vsub.f32 %v3494_v2, %v1275_v28  ;;  %v1283_v41 = vand.u32 4294901760, %v1282_v52 }
  0xaf   :  { %1254 = vmatpush.msra.mxu3 %v1253_v55  ;;  %1195 = vmatpush.msra.mxu2 %v3460_v53  ;;  %v1294_v4 = vsub.f32 %v3533_v45, %v4440_v0  ;;  %v4438_v55 = vand.u32 4294901760, %v3557_v9 }
  0xb0   :  { %1168 = vmatpush.msra.mxu1 %v3276_v56  ;;  %v1265_v56 = vand.u32 4294901760, %v1264_v10  ;;  %1325 = vmatpush.msrb.mxu0 %v3382_v12  ;;  %v1289_v10 = vand.u32 4294901760, %v1288_v16  ;;  %v145_v16 = vld [vmem:[#allocation5 + $0x330] sm:$0xff] }
  0xb1   :  { %1260 = vmatpush.msra.mxu3 %v1259_v14  ;;  %1137 = vmatmul.f32.vlgmr.msra.gmra.mxu0 %v2864_v26  ;;  %v4437_v14 = vand.u32 4294901760, %v3567_v17  ;;  %v1295_v11 = vand.u32 4294901760, %v1294_v4  ;;  %v138_v4 = vld [vmem:[#allocation5 + $0x2f8] sm:$0xff] }
  0xb2   :  { %1170 = vmatpush.msra.mxu1 %v3288_v20  ;;  %1328 = vmatpush.msrb.mxu0 %v3393_v57  ;;  %v1271_v20 = vand.u32 4294901760, %v1270_v32  ;;  %v1306_v32 = vsub.f32 %v3557_v9, %v4438_v55  ;;  %v124_v55 = vld [vmem:[#allocation5 + $0x288] sm:$0xff]  ;;  %v103_v57 = vld [vmem:[#allocation5 + $0x1e0] sm:$0xff] }
  0xb3   :  { %1266 = vmatpush.msra.mxu3 %v1265_v56  ;;  %1197 = vmatpush.msra.mxu2 %v3473_v13  ;;  %v152_v56 = vld [vmem:[#allocation5 + $0x368] sm:$0xff] }
  0xb4   :  { %1172 = vmatpush.msra.mxu1 %v3300_v62  ;;  %1331 = vmatpush.msrb.mxu0 %v3404_v5  ;;  %v1277_v62 = vand.u32 4294901760, %v1276_v47  ;;  %v1301_v47 = vand.u32 4294901760, %v1300_v8  ;;  %v1307_v52 = vand.u32 4294901760, %v1306_v32  ;;  %v131_v32 = vld [vmem:[#allocation5 + $0x2c0] sm:$0xff]  ;;  %v96_v5 = vld [vmem:[#allocation5 + $0x1a8] sm:$0xff] }
  0xb5   :  { %1272 = vmatpush.msra.mxu3 %v1271_v20  ;;  %1199 = vmatpush.msra.mxu2 %v3483_v46  ;;  %v1312_v20 = vsub.f32 %v3567_v17, %v4437_v14 }
  0xb6   :  { %1375 = vmatpush.msrb.mxu1 %v3359_v29  ;;  %1334 = vmatpush.msrb.mxu0 %v3427_v35 }
  0xb7   :  { %1174 = vmatmul.f32.vlgmr.msra.gmra.mxu1 %v2864_v26  ;;  %1278 = vmatpush.msra.mxu3 %v1277_v62  ;;  %v3598_v62 = vand.u32 4294901760, %v152_v56 }
  0xb8   :  { %1377 = vmatpush.msrb.mxu1 %v3365_v59  ;;  %1337 = vmatpush.msrb.mxu0 %v3443_v44  ;;  %v89_v44 = vld [vmem:[#allocation5 + $0x170] sm:$0xff] }
  0xb9   :  { %1201 = vmatpush.msra.mxu2 %v3496_v15  ;;  %1284 = vmatpush.msra.mxu3 %v1283_v41  ;;  %v1313_v41 = vand.u32 4294901760, %v1312_v20  ;;  %v3613_v20 = vand.u32 4294901760, %v138_v4 }
  0xba   :  { %1379 = vmatpush.msrb.mxu1 %v3374_v51  ;;  %1340 = vmatpush.msrb.mxu0 %v3457_v40  ;;  %v294_v8 = vpop.f32.mrf.mxu1 }
  0xbb   :  { %1203 = vmatpush.msra.mxu2 %v3510_v24  ;;  %1290 = vmatpush.msra.mxu3 %v1289_v10  ;;  %v3605_v10 = vand.u32 4294901760, %v145_v16 }
  0xbc   :  { %1381 = vmatpush.msrb.mxu1 %v3384_v31  ;;  %1343 = vmatpush.msrb.mxu0 %v3467_v34  ;;  %v75_v34 = vld [vmem:[#allocation5 + $0x100] sm:$0xff] }
  0xbd   :  { %1205 = vmatpush.msra.mxu2 %v3522_v61  ;;  %1296 = vmatpush.msra.mxu3 %v1295_v11  ;;  %v3609_v11 = vsub.f32 %v152_v56, %v3598_v62  ;;  %v348_v56 = vpop.f32.mrf.mxu2  ;;  %v3622_v18 = vsub.f32 %v145_v16, %v3605_v10  ;;  %v387_v16 = vpop.f32.mrf.mxu3 }
  0xbe   :  { %1383 = vmatpush.msrb.mxu1 %v3401_v23  ;;  %1346 = vmatpush.msrb.mxu0 %v3481_v30 }
  0xbf   :  { %1207 = vmatpush.msra.mxu2 %v3535_v6  ;;  %1302 = vmatpush.msra.mxu3 %v1301_v47  ;;  %v193_v47 = vpop.f32.mrf.mxu0  ;;  %v1562_v27 = vand.u32 4294901760, %v3609_v11 }
  0xc0   :  { %1385 = vmatpush.msrb.mxu1 %v3418_v25  ;;  %1349 = vmatpush.msrb.mxu0 %v3494_v2  ;;  %v295_v14 = vadd.f32 %v294_v8, %v193_v47  ;;  %v3633_v8 = vsub.f32 %v138_v4, %v3613_v20 }
  0xc1   :  { %1209 = vmatpush.msra.mxu2 %v3547_v48  ;;  %1308 = vmatpush.msra.mxu3 %v1307_v52  ;;  %v3619_v52 = vand.u32 4294901760, %v131_v32 }
  0xc2   :  { %1387 = vmatpush.msrb.mxu1 %v3432_v42  ;;  %1352 = vmatpush.msrb.mxu0 %v3508_v49  ;;  %v349_v12 = vadd.f32 %v348_v56, %v295_v14 }
  0xc3   :  { %1416 = vmatpush.msrb.mxu2 %v1221_v38  ;;  %1314 = vmatpush.msra.mxu3 %v1313_v41  ;;  %v117_v38 = vld [vmem:[#allocation5 + $0x250] sm:$0xff]  ;;  %v3630_v41 = vand.u32 4294901760, %v124_v55  ;;  %v3644_v0 = vsub.f32 %v131_v32, %v3619_v52 }
  0xc4   :  { %1389 = vmatpush.msrb.mxu1 %v3445_v63  ;;  %1355 = vmatpush.msrb.mxu0 %v3520_v3  ;;  %v3641_v47 = vand.u32 4294901760, %v117_v38  ;;  %v4470_v3 = vand.u32 4294901760, %v3533_v45 }
  0xc5   :  { %1420 = vmatpush.msrb.mxu2 %v1227_v50  ;;  %1483 = vmatpush.msrb.mxu3 %v3359_v29  ;;  %v110_v50 = vld [vmem:[#allocation5 + $0x218] sm:$0xff]  ;;  %v4442_v29 = vand.u32 4294901760, %v3622_v18  ;;  %v3658_v4 = vsub.f32 %v124_v55, %v3630_v41  ;;  %v1580_v56 = vand.u32 4294901760, %v3644_v0  ;;  %v3669_v55 = vand.u32 4294901760, %v103_v57 }
  0xc6   :  { %1391 = vmatpush.msrb.mxu1 %v3460_v53  ;;  %1358 = vmatpush.msrb.mxu0 %v3533_v45  ;;  %v3655_v14 = vand.u32 4294901760, %v110_v50  ;;  %v3672_v35 = vsub.f32 %v117_v38, %v3641_v47 }
  0xc7   :  { %1424 = vmatpush.msrb.mxu2 %v1233_v39  ;;  %1485 = vmatpush.msrb.mxu3 %v3365_v59  ;;  %v1563_v59 = vsub.f32 %v3609_v11, %v1562_v27  ;;  %v4441_v39 = vand.u32 4294901760, %v3633_v8 }
  0xc8   :  { %1393 = vmatpush.msrb.mxu1 %v3473_v13  ;;  %1361 = vmatpush.msrb.mxu0 %v3545_v58  ;;  %v3686_v38 = vsub.f32 %v110_v50, %v3655_v14  ;;  %v3698_v50 = vsub.f32 %v103_v57, %v3669_v55 }
  0xc9   :  { %1428 = vmatpush.msrb.mxu2 %v1239_v33  ;;  %1487 = vmatpush.msrb.mxu3 %v3374_v51  ;;  %v388_v51 = vadd.f32 %v387_v16, %v349_v12  ;;  %v1569_v33 = vsub.f32 %v3622_v18, %v4442_v29  ;;  %v1586_v12 = vand.u32 4294901760, %v3658_v4  ;;  %v3683_v16 = vand.u32 4294901760, %v96_v5  ;;  %v82_v29 = vld [vmem:[#allocation5 + $0x138] sm:$0xff] }
  0xca   :  { %1395 = vmatpush.msrb.mxu1 %v3483_v46  ;;  %1364 = vmatpush.msrb.mxu0 %v3557_v9  ;;  %v456_v32 = vpop.f32.mrf.mxu0  ;;  %v1598_v57 = vand.u32 4294901760, %v3686_v38 }
  0xcb   :  { %1432 = vmatpush.msrb.mxu2 %v1245_v21  ;;  %1489 = vmatpush.msrb.mxu3 %v3384_v31  ;;  %v1564_v31 = vand.u32 4294901760, %v1563_v59  ;;  %v1575_v21 = vsub.f32 %v3633_v8, %v4441_v39  ;;  %v1581_v59 = vsub.f32 %v3644_v0, %v1580_v56  ;;  %v1592_v39 = vand.u32 4294901760, %v3672_v35 }
  0xcc   :  { %1397 = vmatpush.msrb.mxu1 %v3496_v15  ;;  %1367 = vmatpush.msrb.mxu0 %v3567_v17 }
  0xcd   :  { %1436 = vmatpush.msrb.mxu2 %v1251_v37  ;;  %1491 = vmatpush.msrb.mxu3 %v3401_v23  ;;  %v457_v23 = vadd.f32 %v456_v32, %v388_v51  ;;  %v1570_v37 = vand.u32 4294901760, %v1569_v33  ;;  %v1576_v40 = vand.u32 4294901760, %v1575_v21  ;;  %v1587_v51 = vsub.f32 %v3658_v4, %v1586_v12  ;;  %v68_v21 = vld [vmem:[#allocation5 + $0xc8] sm:$0xff] }
  0xce   :  { %1399 = vmatpush.msrb.mxu1 %v3510_v24  ;;  %1520 = vmatpush.msra.mxu0 %v3598_v62  ;;  %v3711_v33 = vsub.f32 %v96_v5, %v3683_v16  ;;  %v1582_v32 = vand.u32 4294901760, %v1581_v59  ;;  %v1604_v5 = vand.u32 4294901760, %v3698_v50 }
  0xcf   :  { %1440 = vmatpush.msrb.mxu2 %v1257_v22  ;;  %1493 = vmatpush.msrb.mxu3 %v3418_v25  ;;  %v3703_v25 = vand.u32 4294901760, %v89_v44 }
  0xd0   :  { %1401 = vmatpush.msrb.mxu1 %v3522_v61  ;;  %1522 = vmatpush.msra.mxu0 %v3605_v10  ;;  %v1605_v59 = vsub.f32 %v3698_v50, %v1604_v5 }
  0xd1   :  { %1444 = vmatpush.msrb.mxu2 %v1263_v54  ;;  %1495 = vmatpush.msrb.mxu3 %v3432_v42  ;;  %v3716_v54 = vand.u32 4294901760, %v82_v29  ;;  %v3729_v30 = vsub.f32 %v89_v44, %v3703_v25 }
  0xd2   :  { %1403 = vmatpush.msrb.mxu1 %v3535_v6  ;;  %1524 = vmatpush.msra.mxu0 %v3613_v20  ;;  %v493_v22 = vpop.f32.mrf.mxu1 }
  0xd3   :  { %1448 = vmatpush.msrb.mxu2 %v1269_v60  ;;  %1497 = vmatpush.msrb.mxu3 %v3445_v63  ;;  %v494_v42 = vadd.f32 %v493_v22, %v457_v23  ;;  %v3726_v63 = vand.u32 4294901760, %v75_v34  ;;  %v1588_v60 = vand.u32 4294901760, %v1587_v51  ;;  %v1599_v23 = vsub.f32 %v3686_v38, %v1598_v57  ;;  %v54_v22 = vld [vmem:[#allocation5 + $0x58] sm:$0xff] }
  0xd4   :  { %1405 = vmatpush.msrb.mxu1 %v3547_v48  ;;  %1526 = vmatpush.msra.mxu0 %v3619_v52  ;;  %v3742_v2 = vsub.f32 %v82_v29, %v3716_v54  ;;  %v1606_v51 = vand.u32 4294901760, %v1605_v59 }
  0xd5   :  { %1452 = vmatpush.msrb.mxu2 %v1275_v28  ;;  %1499 = vmatpush.msrb.mxu3 %v3460_v53  ;;  %2542 = vst [vmem:[#allocation7] sm:$0xff] %v494_v42  ;;  %v3739_v53 = vand.u32 4294901760, %v68_v21  ;;  %v61_v28 = vld [vmem:[#allocation5 + $0x90] sm:$0xff]  ;;  %v3753_v49 = vsub.f32 %v75_v34, %v3726_v63  ;;  %v47_v34 = vld [vmem:[#allocation5 + $0x20] sm:$0xff]  ;;  %v4471_v42 = vand.u32 4294901760, %v3545_v58  ;;  %v4472_v58 = vand.u32 4294901760, %v3557_v9 }
  0xd6   :  { %1565 = vmatpush.msra.mxu1 %v1564_v31  ;;  %v1593_v31 = vsub.f32 %v3672_v35, %v1592_v39  ;;  %1528 = vmatpush.msra.mxu0 %v3630_v41 }
  0xd7   :  { %1456 = vmatpush.msrb.mxu2 %v1281_v36  ;;  %1501 = vmatpush.msrb.mxu3 %v3473_v13  ;;  %v1616_v13 = vand.u32 4294901760, %v3729_v30  ;;  %v1600_v36 = vand.u32 4294901760, %v1599_v23  ;;  %v3789_v23 = vand.u32 4294901760, %v47_v34 }
  0xd8   :  { %1571 = vmatpush.msra.mxu1 %v1570_v37  ;;  %v1610_v37 = vand.u32 4294901760, %v3711_v33  ;;  %1530 = vmatpush.msra.mxu0 %v3641_v47  ;;  %v1594_v44 = vand.u32 4294901760, %v1593_v31 }
  0xd9   :  { %1460 = vmatpush.msrb.mxu2 %v1287_v19  ;;  %1503 = vmatpush.msrb.mxu3 %v3483_v46  ;;  %v1622_v46 = vand.u32 4294901760, %v3742_v2  ;;  %v3766_v19 = vsub.f32 %v68_v21, %v3739_v53  ;;  %v1617_v45 = vsub.f32 %v3729_v30, %v1616_v13 }
  0xda   :  { %1577 = vmatpush.msra.mxu1 %v1576_v40  ;;  %1532 = vmatpush.msra.mxu0 %v3655_v14  ;;  %v1611_v29 = vsub.f32 %v3711_v33, %v1610_v37  ;;  %v3759_v40 = vand.u32 4294901760, %v61_v28 }
  0xdb   :  { %1464 = vmatpush.msrb.mxu2 %v4470_v3  ;;  %1505 = vmatpush.msrb.mxu3 %v3496_v15  ;;  %v1628_v15 = vand.u32 4294901760, %v3753_v49  ;;  %v1618_v9 = vand.u32 4294901760, %v1617_v45 }
  0xdc   :  { %1583 = vmatpush.msra.mxu1 %v1582_v32  ;;  %1534 = vmatpush.msra.mxu0 %v3669_v55  ;;  %v3776_v32 = vand.u32 4294901760, %v54_v22  ;;  %v1612_v31 = vand.u32 4294901760, %v1611_v29  ;;  %v3780_v21 = vsub.f32 %v61_v28, %v3759_v40 }
  0xdd   :  { %1468 = vmatpush.msrb.mxu2 %v4471_v42  ;;  %1507 = vmatpush.msrb.mxu3 %v3510_v24  ;;  %v1623_v24 = vsub.f32 %v3742_v2, %v1622_v46 }
  0xde   :  { %1589 = vmatpush.msra.mxu1 %v1588_v60  ;;  %1536 = vmatpush.msra.mxu0 %v3683_v16  ;;  %v1634_v60 = vand.u32 4294901760, %v3766_v19  ;;  %v3799_v28 = vsub.f32 %v54_v22, %v3776_v32  ;;  %v1640_v59 = vand.u32 4294901760, %v3780_v21 }
  0xdf   :  { %1472 = vmatpush.msrb.mxu2 %v4472_v58  ;;  %1509 = vmatpush.msrb.mxu3 %v3522_v61  ;;  %v1629_v61 = vsub.f32 %v3753_v49, %v1628_v15 }
  0xe0   :  { %1595 = vmatpush.msra.mxu1 %v1594_v44  ;;  %1538 = vmatpush.msra.mxu0 %v3703_v25  ;;  %v4473_v44 = vand.u32 4294901760, %v3567_v17  ;;  %v1624_v17 = vand.u32 4294901760, %v1623_v24  ;;  %v1646_v22 = vand.u32 4294901760, %v3799_v28  ;;  %v153_v24 = vld [vmem:[#allocation5 + $0x370] sm:$0xff] }
  0xe1   :  { %1511 = vmatpush.msrb.mxu3 %v3535_v6  ;;  %1215 = vmatmul.f32.vlgmr.msra.gmra.mxu2 %v2956_v1  ;;  %v1635_v6 = vsub.f32 %v3766_v19, %v1634_v60  ;;  %v1630_v29 = vand.u32 4294901760, %v1629_v61  ;;  %v3851_v61 = vand.u32 4294901760, %v153_v24 }
  0xe2   :  { %1601 = vmatpush.msra.mxu1 %v1600_v36  ;;  %1476 = vmatpush.msrb.mxu2 %v4473_v44  ;;  %v3809_v36 = vsub.f32 %v47_v34, %v3789_v23  ;;  %v1647_v34 = vsub.f32 %v3799_v28, %v1646_v22  ;;  %v146_v44 = vld [vmem:[#allocation5 + $0x338] sm:$0xff] }
  0xe3   :  { %1540 = vmatpush.msra.mxu0 %v3716_v54  ;;  %1513 = vmatpush.msrb.mxu3 %v3547_v48  ;;  %v1641_v48 = vsub.f32 %v3780_v21, %v1640_v59  ;;  %v1636_v3 = vand.u32 4294901760, %v1635_v6  ;;  %v125_v6 = vld [vmem:[#allocation5 + $0x290] sm:$0xff] }
  0xe4   :  { %1607 = vmatpush.msra.mxu1 %v1606_v51  ;;  %1663 = vmatpush.msra.mxu2 %v3609_v11  ;;  %v1652_v51 = vand.u32 4294901760, %v3809_v36  ;;  %v4475_v11 = vand.u32 4294901760, %v3633_v8 }
  0xe5   :  { %1542 = vmatpush.msra.mxu0 %v3726_v63  ;;  %1316 = vmatmul.f32.vlgmr.msra.gmra.mxu3 %v2864_v26  ;;  %v1642_v42 = vand.u32 4294901760, %v1641_v48 }
  0xe6   :  { %1613 = vmatpush.msra.mxu1 %v1612_v31  ;;  %1666 = vmatpush.msra.mxu2 %v3622_v18  ;;  %v1653_v45 = vsub.f32 %v3809_v36, %v1652_v51  ;;  %v1648_v31 = vand.u32 4294901760, %v1647_v34 }
  0xe7   :  { %1716 = vmatpush.msra.mxu3 %v3598_v62  ;;  %1544 = vmatpush.msra.mxu0 %v3739_v53 }
  0xe8   :  { %1619 = vmatpush.msra.mxu1 %v1618_v9  ;;  %1669 = vmatpush.msra.mxu2 %v3633_v8  ;;  %v1654_v58 = vand.u32 4294901760, %v1653_v45  ;;  %v4474_v9 = vand.u32 4294901760, %v3622_v18  ;;  %v132_v18 = vld [vmem:[#allocation5 + $0x2c8] sm:$0xff]  ;;  %v3866_v8 = vsub.f32 %v153_v24, %v3851_v61  ;;  %v97_v24 = vld [vmem:[#allocation5 + $0x1b0] sm:$0xff] }
  0xe9   :  { %1718 = vmatpush.msra.mxu3 %v3605_v10  ;;  %1546 = vmatpush.msra.mxu0 %v3759_v40 }
  0xea   :  { %1625 = vmatpush.msra.mxu1 %v1624_v17  ;;  %1672 = vmatpush.msra.mxu2 %v3644_v0  ;;  %v139_v17 = vld [vmem:[#allocation5 + $0x300] sm:$0xff] }
  0xeb   :  { %1720 = vmatpush.msra.mxu3 %v3613_v20  ;;  %1548 = vmatpush.msra.mxu0 %v3776_v32 }
  0xec   :  { %1631 = vmatpush.msra.mxu1 %v1630_v29  ;;  %1478 = vmatmul.f32.vlgmr.msrb.gmra.mxu2 %v2864_v26 }
  0xed   :  { %1722 = vmatpush.msra.mxu3 %v3619_v52  ;;  %1675 = vmatpush.msra.mxu2 %v3658_v4 }
  0xee   :  { %1637 = vmatpush.msra.mxu1 %v1636_v3  ;;  %1550 = vmatpush.msra.mxu0 %v3789_v23 }
  0xef   :  { %1370 = vmatmul.f32.vlgmr.msrb.gmra.mxu0 %v2888_v7  ;;  %1515 = vmatmul.f32.vlgmr.msrb.gmra.mxu3 %v2864_v26 }
  0xf0   :  { %1643 = vmatpush.msra.mxu1 %v1642_v42  ;;  %1678 = vmatpush.msra.mxu2 %v3672_v35 }
  0xf1   :  { %1724 = vmatpush.msra.mxu3 %v3630_v41  ;;  %1757 = vmatpush.msrb.mxu0 %v1562_v27  ;;  %v3856_v27 = vand.u32 4294901760, %v146_v44 }
  0xf2   :  { %1649 = vmatpush.msra.mxu1 %v1648_v31  ;;  %1681 = vmatpush.msra.mxu2 %v3686_v38 }
  0xf3   :  { %1409 = vmatmul.f32.vlgmr.msrb.gmra.mxu1 %v2914_v43  ;;  %1726 = vmatpush.msra.mxu3 %v3641_v47  ;;  %v3874_v0 = vsub.f32 %v146_v44, %v3856_v27 }
  0xf4   :  { %1761 = vmatpush.msrb.mxu0 %v4474_v9  ;;  %1655 = vmatpush.msra.mxu1 %v1654_v58 }
  0xf5   :  { %1684 = vmatpush.msra.mxu2 %v3698_v50  ;;  %1728 = vmatpush.msra.mxu3 %v3655_v14 }
  0xf6   :  { %1765 = vmatpush.msrb.mxu0 %v4475_v11  ;;  %1824 = vmatpush.msrb.mxu1 %v3598_v62  ;;  %v3868_v62 = vand.u32 4294901760, %v139_v17 }
  0xf7   :  { %1687 = vmatpush.msra.mxu2 %v3711_v33  ;;  %1730 = vmatpush.msra.mxu3 %v3669_v55 }
  0xf8   :  { %1769 = vmatpush.msrb.mxu0 %v1580_v56  ;;  %1826 = vmatpush.msrb.mxu1 %v3605_v10  ;;  %v3878_v10 = vand.u32 4294901760, %v132_v18  ;;  %v534_v56 = vpop.f32.mrf.mxu2  ;;  %v3887_v4 = vsub.f32 %v139_v17, %v3868_v62 }
  0xf9   :  { %1690 = vmatpush.msra.mxu2 %v3729_v30  ;;  %1732 = vmatpush.msra.mxu3 %v3683_v16 }
  0xfa   :  { %1773 = vmatpush.msrb.mxu0 %v1586_v12  ;;  %1828 = vmatpush.msrb.mxu1 %v3613_v20  ;;  %v1903_v20 = vand.u32 4294901760, %v3866_v8  ;;  %v3895_v12 = vand.u32 4294901760, %v125_v6  ;;  %v3898_v29 = vsub.f32 %v132_v18, %v3878_v10 }
  0xfb   :  { %1693 = vmatpush.msra.mxu2 %v3742_v2  ;;  %1734 = vmatpush.msra.mxu3 %v3703_v25  ;;  %v90_v2 = vld [vmem:[#allocation5 + $0x178] sm:$0xff] }
  0xfc   :  { %1777 = vmatpush.msrb.mxu0 %v1592_v39  ;;  %1830 = vmatpush.msrb.mxu1 %v3619_v52  ;;  %v1909_v39 = vand.u32 4294901760, %v3874_v0  ;;  %v635_v35 = vpop.f32.mrf.mxu3  ;;  %v118_v52 = vld [vmem:[#allocation5 + $0x258] sm:$0xff]  ;;  %v1904_v38 = vsub.f32 %v3866_v8, %v1903_v20  ;;  %v1921_v34 = vand.u32 4294901760, %v3898_v29  ;;  %v3921_v42 = vsub.f32 %v125_v6, %v3895_v12 }
  0xfd   :  { %1696 = vmatpush.msra.mxu2 %v3753_v49  ;;  %1736 = vmatpush.msra.mxu3 %v3716_v54  ;;  %v636_v48 = vadd.f32 %v635_v35, %v534_v56  ;;  %v3909_v3 = vand.u32 4294901760, %v118_v52  ;;  %v83_v35 = vld [vmem:[#allocation5 + $0x140] sm:$0xff] }
  0xfe   :  { %1781 = vmatpush.msrb.mxu0 %v1598_v57  ;;  %1832 = vmatpush.msrb.mxu1 %v3630_v41  ;;  %v111_v41 = vld [vmem:[#allocation5 + $0x220] sm:$0xff]  ;;  %v1915_v57 = vand.u32 4294901760, %v3887_v4  ;;  %v689_v50 = vpop.f32.mrf.mxu0  ;;  %v1922_v44 = vsub.f32 %v3898_v29, %v1921_v34  ;;  %v1927_v9 = vand.u32 4294901760, %v3921_v42 }
  0xff   :  { %1699 = vmatpush.msra.mxu2 %v3766_v19  ;;  %1738 = vmatpush.msra.mxu3 %v3726_v63  ;;  %v690_v45 = vadd.f32 %v689_v50, %v636_v48  ;;  %v3923_v33 = vand.u32 4294901760, %v111_v41  ;;  %v3934_v31 = vsub.f32 %v118_v52, %v3909_v3  ;;  %v3976_v19 = vand.u32 4294901760, %v83_v35  ;;  %v69_v50 = vld [vmem:[#allocation5 + $0xd0] sm:$0xff] }
 0x100   :  { %1785 = vmatpush.msrb.mxu0 %v1604_v5  ;;  %1834 = vmatpush.msrb.mxu1 %v3641_v47  ;;  %v1910_v47 = vsub.f32 %v3874_v0, %v1909_v39  ;;  %v104_v5 = vld [vmem:[#allocation5 + $0x1e8] sm:$0xff]  ;;  %v1928_v52 = vsub.f32 %v3921_v42, %v1927_v9 }
 0x101   :  { %1702 = vmatpush.msra.mxu2 %v3780_v21  ;;  %1740 = vmatpush.msra.mxu3 %v3739_v53  ;;  %v3936_v58 = vand.u32 4294901760, %v104_v5  ;;  %v3948_v17 = vsub.f32 %v111_v41, %v3923_v33  ;;  %v1933_v18 = vand.u32 4294901760, %v3934_v31 }
 0x102   :  { %1789 = vmatpush.msrb.mxu0 %v1610_v37  ;;  %1836 = vmatpush.msrb.mxu1 %v3655_v14  ;;  %v1905_v14 = vand.u32 4294901760, %v1904_v38  ;;  %v1916_v37 = vsub.f32 %v3887_v4, %v1915_v57  ;;  %v728_v30 = vpop.f32.mrf.mxu1  ;;  %v76_v38 = vld [vmem:[#allocation5 + $0x108] sm:$0xff] }
 0x103   :  { %1705 = vmatpush.msra.mxu2 %v3799_v28  ;;  %1742 = vmatpush.msra.mxu3 %v3759_v40  ;;  %v729_v11 = vadd.f32 %v728_v30, %v690_v45  ;;  %v3958_v6 = vsub.f32 %v104_v5, %v3936_v58  ;;  %v1939_v48 = vand.u32 4294901760, %v3948_v17  ;;  %v3989_v21 = vand.u32 4294901760, %v76_v38  ;;  %v62_v45 = vld [vmem:[#allocation5 + $0x98] sm:$0xff]  ;;  %v48_v30 = vld [vmem:[#allocation5 + $0x28] sm:$0xff] }
 0x104   :  { %1793 = vmatpush.msrb.mxu0 %v1616_v13  ;;  %1838 = vmatpush.msrb.mxu1 %v3669_v55  ;;  %v1911_v55 = vand.u32 4294901760, %v1910_v47  ;;  %v797_v13 = vpop.f32.mrf.mxu2  ;;  %v4000_v28 = vsub.f32 %v83_v35, %v3976_v19 }
 0x105   :  { %1708 = vmatpush.msra.mxu2 %v3809_v36  ;;  %1744 = vmatpush.msra.mxu3 %v3776_v32  ;;  %v798_v56 = vadd.f32 %v797_v13, %v729_v11  ;;  %v1945_v47 = vand.u32 4294901760, %v3958_v6  ;;  %v1940_v5 = vsub.f32 %v3948_v17, %v1939_v48 }
 0x106   :  { %1797 = vmatpush.msrb.mxu0 %v1622_v46  ;;  %1840 = vmatpush.msrb.mxu1 %v3683_v16  ;;  %v3953_v16 = vand.u32 4294901760, %v97_v24  ;;  %v1917_v46 = vand.u32 4294901760, %v1916_v37  ;;  %v834_v49 = vpop.f32.mrf.mxu3 }
 0x107   :  { %1861 = vmatpush.msrb.mxu2 %v3851_v61  ;;  %1746 = vmatpush.msra.mxu3 %v3789_v23  ;;  %v835_v41 = vadd.f32 %v834_v49, %v798_v56  ;;  %v1946_v37 = vsub.f32 %v3958_v6, %v1945_v47  ;;  %v4039_v49 = vand.u32 4294901760, %v48_v30 }
 0x108   :  { %1801 = vmatpush.msrb.mxu0 %v1628_v15  ;;  %1842 = vmatpush.msrb.mxu1 %v3703_v25  ;;  %v3963_v25 = vand.u32 4294901760, %v90_v2  ;;  %v1923_v15 = vand.u32 4294901760, %v1922_v44  ;;  %v1963_v44 = vand.u32 4294901760, %v4000_v28 }
 0x109   :  { %1863 = vmatpush.msrb.mxu2 %v3856_v27  ;;  %1906 = vmatpush.msrb.mxu3 %v1905_v14  ;;  %2543 = vst [vmem:[#allocation7 + $0x8] sm:$0xff] %v835_v41 }
 0x10a   :  { %1805 = vmatpush.msrb.mxu0 %v1634_v60  ;;  %1844 = vmatpush.msrb.mxu1 %v3716_v54  ;;  %v3974_v54 = vsub.f32 %v97_v24, %v3953_v16  ;;  %v1934_v60 = vsub.f32 %v3934_v31, %v1933_v18  ;;  %v55_v24 = vld [vmem:[#allocation5 + $0x60] sm:$0xff] }
 0x10b   :  { %1865 = vmatpush.msrb.mxu2 %v3868_v62  ;;  %1912 = vmatpush.msrb.mxu3 %v1911_v55  ;;  %v4015_v55 = vand.u32 4294901760, %v62_v45 }
 0x10c   :  { %1809 = vmatpush.msrb.mxu0 %v1640_v59  ;;  %1846 = vmatpush.msrb.mxu1 %v3726_v63  ;;  %v3987_v63 = vsub.f32 %v90_v2, %v3963_v25  ;;  %v1929_v59 = vand.u32 4294901760, %v1928_v52  ;;  %v1935_v14 = vand.u32 4294901760, %v1934_v60  ;;  %v4027_v2 = vand.u32 4294901760, %v55_v24 }
 0x10d   :  { %1867 = vmatpush.msrb.mxu2 %v3878_v10  ;;  %1918 = vmatpush.msrb.mxu3 %v1917_v46  ;;  %v1947_v46 = vand.u32 4294901760, %v1946_v37  ;;  %v4037_v35 = vsub.f32 %v62_v45, %v4015_v55 }
 0x10e   :  { %1813 = vmatpush.msrb.mxu0 %v1646_v22  ;;  %1848 = vmatpush.msrb.mxu1 %v3739_v53  ;;  %v1951_v53 = vand.u32 4294901760, %v3974_v54  ;;  %v4002_v22 = vand.u32 4294901760, %v69_v50  ;;  %v1957_v36 = vand.u32 4294901760, %v3987_v63  ;;  %v4049_v41 = vsub.f32 %v55_v24, %v4027_v2 }
 0x10f   :  { %1711 = vmatmul.f32.vlgmr.msra.gmra.mxu2 %v2888_v7  ;;  %1924 = vmatpush.msrb.mxu3 %v1923_v15 }
 0x110   :  { %1869 = vmatpush.msrb.mxu2 %v3895_v12  ;;  %1817 = vmatpush.msrb.mxu0 %v1652_v51  ;;  %v4013_v51 = vsub.f32 %v76_v38, %v3989_v21  ;;  %v1952_v13 = vsub.f32 %v3974_v54, %v1951_v53  ;;  %v4025_v11 = vsub.f32 %v69_v50, %v4002_v22  ;;  %v4445_v50 = vand.u32 4294901760, %v4037_v35 }
 0x111   :  { %1850 = vmatpush.msrb.mxu1 %v3759_v40  ;;  %1556 = vmatmul.f32.vlgmr.msra.gmra.mxu0 %v2956_v1  ;;  %v1941_v40 = vand.u32 4294901760, %v1940_v5 }
 0x112   :  { %1750 = vmatmul.f32.vlgmr.msra.gmra.mxu3 %v2914_v43  ;;  %1871 = vmatpush.msrb.mxu2 %v3909_v3  ;;  %v1969_v56 = vand.u32 4294901760, %v4013_v51  ;;  %v1953_v15 = vand.u32 4294901760, %v1952_v13  ;;  %v4446_v52 = vand.u32 4294901760, %v4025_v11  ;;  %v1982_v24 = vsub.f32 %v4037_v35, %v4445_v50 }
 0x113   :  { %1930 = vmatpush.msrb.mxu3 %v1929_v59  ;;  %2004 = vmatpush.msra.mxu0 %v3866_v8  ;;  %v4059_v59 = vsub.f32 %v48_v30, %v4039_v49 }
 0x114   :  { %1852 = vmatpush.msrb.mxu1 %v3776_v32  ;;  %1873 = vmatpush.msrb.mxu2 %v3923_v33  ;;  %v1958_v32 = vsub.f32 %v3987_v63, %v1957_v36  ;;  %v1970_v60 = vsub.f32 %v4013_v51, %v1969_v56  ;;  %v1976_v45 = vsub.f32 %v4025_v11, %v4446_v52 }
 0x115   :  { %1657 = vmatmul.f32.vlgmr.msra.gmra.mxu1 %v2864_v26  ;;  %1936 = vmatpush.msrb.mxu3 %v1935_v14  ;;  %v4444_v14 = vand.u32 4294901760, %v4049_v41 }
 0x116   :  { %2007 = vmatpush.msra.mxu0 %v3874_v0  ;;  %1854 = vmatpush.msrb.mxu1 %v3789_v23  ;;  %v1964_v23 = vsub.f32 %v4000_v28, %v1963_v44  ;;  %v1959_v38 = vand.u32 4294901760, %v1958_v32  ;;  %v1971_v37 = vand.u32 4294901760, %v1970_v60  ;;  %v1977_v30 = vand.u32 4294901760, %v1976_v45 }
 0x117   :  { %1875 = vmatpush.msrb.mxu2 %v3936_v58  ;;  %1942 = vmatpush.msrb.mxu3 %v1941_v40  ;;  %v4443_v40 = vand.u32 4294901760, %v4059_v59  ;;  %v1988_v13 = vsub.f32 %v4049_v41, %v4444_v14  ;;  %v1983_v32 = vand.u32 4294901760, %v1982_v24 }
 0x118   :  { %2010 = vmatpush.msra.mxu0 %v3887_v4  ;;  %2057 = vmatpush.msra.mxu1 %v3851_v61  ;;  %v1965_v5 = vand.u32 4294901760, %v1964_v23  ;;  %v147_v23 = vld [vmem:[#allocation5 + $0x340] sm:$0xff] }
 0x119   :  { %1877 = vmatpush.msrb.mxu2 %v3953_v16  ;;  %1948 = vmatpush.msrb.mxu3 %v1947_v46  ;;  %v154_v46 = vld [vmem:[#allocation5 + $0x378] sm:$0xff]  ;;  %v4095_v45 = vand.u32 4294901760, %v147_v23 }
 0x11a   :  { %2013 = vmatpush.msra.mxu0 %v3898_v29  ;;  %2059 = vmatpush.msra.mxu1 %v3856_v27  ;;  %v4090_v60 = vand.u32 4294901760, %v154_v46 }
 0x11b   :  { %1819 = vmatmul.f32.vlgmr.msrb.gmra.mxu0 %v2864_v26  ;;  %1879 = vmatpush.msrb.mxu2 %v3963_v25 }
 0x11c   :  { %1954 = vmatpush.msrb.mxu3 %v1953_v15  ;;  %2016 = vmatpush.msra.mxu0 %v3921_v42  ;;  %v1994_v15 = vsub.f32 %v4059_v59, %v4443_v40  ;;  %v4101_v24 = vsub.f32 %v154_v46, %v4090_v60  ;;  %v126_v40 = vld [vmem:[#allocation5 + $0x298] sm:$0xff] }
 0x11d   :  { %2061 = vmatpush.msra.mxu1 %v3868_v62  ;;  %1881 = vmatpush.msrb.mxu2 %v3976_v19  ;;  %v4122_v50 = vand.u32 4294901760, %v126_v40 }
 0x11e   :  { %1856 = vmatmul.f32.vlgmr.msrb.gmra.mxu1 %v2864_v26  ;;  %1960 = vmatpush.msrb.mxu3 %v1959_v38  ;;  %v1989_v38 = vand.u32 4294901760, %v1988_v13  ;;  %v133_v13 = vld [vmem:[#allocation5 + $0x2d0] sm:$0xff] }
 0x11f   :  { %2019 = vmatpush.msra.mxu0 %v3934_v31  ;;  %2063 = vmatpush.msra.mxu1 %v3878_v10  ;;  %v4114_v14 = vand.u32 4294901760, %v133_v13  ;;  %v91_v31 = vld [vmem:[#allocation5 + $0x180] sm:$0xff] }
 0x120   :  { %1883 = vmatpush.msrb.mxu2 %v3989_v21  ;;  %1966 = vmatpush.msrb.mxu3 %v1965_v5  ;;  %v1995_v5 = vand.u32 4294901760, %v1994_v15  ;;  %v4110_v15 = vsub.f32 %v147_v23, %v4095_v45  ;;  %v1069_v23 = vpop.f32.mrf.mxu3 }
 0x121   :  { %2022 = vmatpush.msra.mxu0 %v3948_v17  ;;  %2065 = vmatpush.msra.mxu1 %v3895_v12 }
 0x122   :  { %1885 = vmatpush.msrb.mxu2 %v4002_v22  ;;  %1972 = vmatpush.msrb.mxu3 %v1971_v37  ;;  %v140_v37 = vld [vmem:[#allocation5 + $0x308] sm:$0xff]  ;;  %v4448_v0 = vand.u32 4294901760, %v4110_v15 }
 0x123   :  { %2025 = vmatpush.msra.mxu0 %v3958_v6  ;;  %2067 = vmatpush.msra.mxu1 %v3909_v3  ;;  %v77_v6 = vld [vmem:[#allocation5 + $0x110] sm:$0xff] }
 0x124   :  { %1887 = vmatpush.msrb.mxu2 %v4015_v55  ;;  %1978 = vmatpush.msrb.mxu3 %v1977_v30  ;;  %v875_v30 = vpop.f32.mrf.mxu0 }
 0x125   :  { %2028 = vmatpush.msra.mxu0 %v3974_v54  ;;  %2069 = vmatpush.msra.mxu1 %v3923_v33  ;;  %v4218_v54 = vand.u32 4294901760, %v77_v6 }
 0x126   :  { %1889 = vmatpush.msrb.mxu2 %v4027_v2  ;;  %1984 = vmatpush.msrb.mxu3 %v1983_v32  ;;  %v4105_v32 = vand.u32 4294901760, %v140_v37  ;;  %v976_v46 = vpop.f32.mrf.mxu1 }
 0x127   :  { %2031 = vmatpush.msra.mxu0 %v3987_v63  ;;  %2071 = vmatpush.msra.mxu1 %v3936_v58  ;;  %v977_v8 = vadd.f32 %v976_v46, %v875_v30  ;;  %v4136_v46 = vsub.f32 %v133_v13, %v4114_v14  ;;  %v4150_v13 = vsub.f32 %v126_v40, %v4122_v50 }
 0x128   :  { %1891 = vmatpush.msrb.mxu2 %v4039_v49  ;;  %1990 = vmatpush.msrb.mxu3 %v1989_v38  ;;  %v1030_v38 = vpop.f32.mrf.mxu2  ;;  %v4125_v52 = vsub.f32 %v140_v37, %v4105_v32 }
 0x129   :  { %2034 = vmatpush.msra.mxu0 %v4000_v28  ;;  %2073 = vmatpush.msra.mxu1 %v3953_v16  ;;  %v4245_v28 = vsub.f32 %v77_v6, %v4218_v54  ;;  %v4477_v6 = vand.u32 4294901760, %v4037_v35 }
 0x12a   :  { %2098 = vmatpush.msra.mxu2 %v1903_v20  ;;  %1996 = vmatpush.msrb.mxu3 %v1995_v5  ;;  %v2244_v20 = vand.u32 4294901760, %v4101_v24  ;;  %v119_v5 = vld [vmem:[#allocation5 + $0x260] sm:$0xff]  ;;  %v4447_v37 = vand.u32 4294901760, %v4125_v52 }
 0x12b   :  { %2037 = vmatpush.msra.mxu0 %v4013_v51  ;;  %2075 = vmatpush.msra.mxu1 %v3963_v25  ;;  %v4133_v30 = vand.u32 4294901760, %v119_v5  ;;  %v4476_v51 = vand.u32 4294901760, %v4025_v11 }
 0x12c   :  { %2102 = vmatpush.msra.mxu2 %v1909_v39  ;;  %2165 = vmatpush.msra.mxu3 %v3851_v61  ;;  %v1031_v61 = vadd.f32 %v1030_v38, %v977_v8  ;;  %v112_v39 = vld [vmem:[#allocation5 + $0x228] sm:$0xff] }
 0x12d   :  { %2040 = vmatpush.msra.mxu0 %v4025_v11  ;;  %2077 = vmatpush.msra.mxu1 %v3976_v19  ;;  %v4147_v38 = vand.u32 4294901760, %v112_v39  ;;  %v4164_v42 = vsub.f32 %v119_v5, %v4133_v30 }
 0x12e   :  { %2106 = vmatpush.msra.mxu2 %v1915_v57  ;;  %2167 = vmatpush.msra.mxu3 %v3856_v27  ;;  %v2245_v27 = vsub.f32 %v4101_v24, %v2244_v20  ;;  %v1070_v4 = vadd.f32 %v1069_v23, %v1031_v61  ;;  %v105_v57 = vld [vmem:[#allocation5 + $0x1f0] sm:$0xff]  ;;  %v1138_v29 = vpop.f32.mrf.mxu0  ;;  %v2262_v23 = vand.u32 4294901760, %v4136_v46 }
 0x12f   :  { %2043 = vmatpush.msra.mxu0 %v4037_v35  ;;  %2079 = vmatpush.msra.mxu1 %v3989_v21  ;;  %v4161_v40 = vand.u32 4294901760, %v105_v57  ;;  %v4178_v5 = vsub.f32 %v112_v39, %v4147_v38  ;;  %v4478_v35 = vand.u32 4294901760, %v4049_v41 }
 0x130   :  { %2110 = vmatpush.msra.mxu2 %v1921_v34  ;;  %2169 = vmatpush.msra.mxu3 %v3868_v62  ;;  %v2251_v62 = vsub.f32 %v4110_v15, %v4448_v0  ;;  %v98_v34 = vld [vmem:[#allocation5 + $0x1b8] sm:$0xff]  ;;  %v1139_v8 = vadd.f32 %v1138_v29, %v1070_v4  ;;  %v2268_v4 = vand.u32 4294901760, %v4150_v13  ;;  %v84_v0 = vld [vmem:[#allocation5 + $0x148] sm:$0xff] }
 0x131   :  { %2046 = vmatpush.msra.mxu0 %v4049_v41  ;;  %2081 = vmatpush.msra.mxu1 %v4002_v22  ;;  %v4175_v29 = vand.u32 4294901760, %v98_v34  ;;  %v4190_v39 = vsub.f32 %v105_v57, %v4161_v40  ;;  %v2280_v57 = vand.u32 4294901760, %v4178_v5 }
 0x132   :  { %2114 = vmatpush.msra.mxu2 %v1927_v9  ;;  %2171 = vmatpush.msra.mxu3 %v3878_v10  ;;  %v2246_v10 = vand.u32 4294901760, %v2245_v27  ;;  %v2257_v9 = vsub.f32 %v4125_v52, %v4447_v37  ;;  %v2263_v27 = vsub.f32 %v4136_v46, %v2262_v23  ;;  %v2274_v37 = vand.u32 4294901760, %v4164_v42 }
 0x133   :  { %2049 = vmatpush.msra.mxu0 %v4059_v59  ;;  %2083 = vmatpush.msra.mxu1 %v4015_v55 }
 0x134   :  { %2118 = vmatpush.msra.mxu2 %v1933_v18  ;;  %2173 = vmatpush.msra.mxu3 %v3895_v12  ;;  %v1175_v61 = vpop.f32.mrf.mxu1  ;;  %v2252_v18 = vand.u32 4294901760, %v2251_v62  ;;  %v2258_v17 = vand.u32 4294901760, %v2257_v9  ;;  %v4203_v62 = vsub.f32 %v98_v34, %v4175_v29  ;;  %v70_v34 = vld [vmem:[#allocation5 + $0xd8] sm:$0xff]  ;;  %v2281_v9 = vsub.f32 %v4178_v5, %v2280_v57 }
 0x135   :  { %2202 = vmatpush.msrb.mxu0 %v4090_v60  ;;  %2085 = vmatpush.msra.mxu1 %v4027_v2  ;;  %v1176_v12 = vadd.f32 %v1175_v61, %v1139_v8  ;;  %v2275_v8 = vsub.f32 %v4164_v42, %v2274_v37 }
 0x136   :  { %2122 = vmatpush.msra.mxu2 %v1939_v48  ;;  %2175 = vmatpush.msra.mxu3 %v3909_v3  ;;  %v4195_v3 = vand.u32 4294901760, %v91_v31  ;;  %v2269_v48 = vsub.f32 %v4150_v13, %v2268_v4  ;;  %v2292_v61 = vand.u32 4294901760, %v4203_v62 }
 0x137   :  { %2204 = vmatpush.msrb.mxu0 %v4095_v45  ;;  %2087 = vmatpush.msra.mxu1 %v4039_v49  ;;  %2544 = vst [vmem:[#allocation7 + $0x10] sm:$0xff] %v1176_v12 }
 0x138   :  { %2126 = vmatpush.msra.mxu2 %v1945_v47  ;;  %2177 = vmatpush.msra.mxu3 %v3923_v33  ;;  %v4208_v33 = vand.u32 4294901760, %v84_v0  ;;  %v2264_v47 = vand.u32 4294901760, %v2263_v27  ;;  %v56_v27 = vld [vmem:[#allocation5 + $0x68] sm:$0xff] }
 0x139   :  { %2206 = vmatpush.msrb.mxu0 %v4105_v32  ;;  %2247 = vmatpush.msrb.mxu1 %v2246_v10  ;;  %v2286_v10 = vand.u32 4294901760, %v4190_v39 }
 0x13a   :  { %2130 = vmatpush.msra.mxu2 %v1951_v53  ;;  %2179 = vmatpush.msra.mxu3 %v3936_v58  ;;  %v4221_v58 = vsub.f32 %v91_v31, %v4195_v3  ;;  %v2270_v53 = vand.u32 4294901760, %v2269_v48  ;;  %v4234_v63 = vsub.f32 %v84_v0, %v4208_v33  ;;  %v2276_v31 = vand.u32 4294901760, %v2275_v8  ;;  %v49_v48 = vld [vmem:[#allocation5 + $0x30] sm:$0xff] }
 0x13b   :  { %2208 = vmatpush.msrb.mxu0 %v4114_v14  ;;  %2253 = vmatpush.msrb.mxu1 %v2252_v18  ;;  %v2287_v12 = vsub.f32 %v4190_v39, %v2286_v10  ;;  %v2293_v0 = vsub.f32 %v4203_v62, %v2292_v61 }
 0x13c   :  { %2134 = vmatpush.msra.mxu2 %v1957_v36  ;;  %2181 = vmatpush.msra.mxu3 %v3953_v16  ;;  %v4231_v16 = vand.u32 4294901760, %v70_v34  ;;  %v63_v36 = vld [vmem:[#allocation5 + $0xa0] sm:$0xff] }
 0x13d   :  { %2210 = vmatpush.msrb.mxu0 %v4122_v50  ;;  %2259 = vmatpush.msrb.mxu1 %v2258_v17  ;;  %v4251_v18 = vand.u32 4294901760, %v63_v36  ;;  %v2288_v17 = vand.u32 4294901760, %v2287_v12  ;;  %v2294_v8 = vand.u32 4294901760, %v2293_v0 }
 0x13e   :  { %2138 = vmatpush.msra.mxu2 %v1963_v44  ;;  %2183 = vmatpush.msra.mxu3 %v3963_v25  ;;  %v2298_v25 = vand.u32 4294901760, %v4221_v58  ;;  %v2282_v44 = vand.u32 4294901760, %v2281_v9  ;;  %v4281_v9 = vand.u32 4294901760, %v49_v48 }
 0x13f   :  { %2212 = vmatpush.msrb.mxu0 %v4133_v30  ;;  %2265 = vmatpush.msrb.mxu1 %v2264_v47  ;;  %v4268_v47 = vand.u32 4294901760, %v56_v27 }
 0x140   :  { %2142 = vmatpush.msra.mxu2 %v1969_v56  ;;  %2185 = vmatpush.msra.mxu3 %v3976_v19  ;;  %v2304_v19 = vand.u32 4294901760, %v4234_v63  ;;  %v4258_v56 = vsub.f32 %v70_v34, %v4231_v16  ;;  %v2299_v11 = vsub.f32 %v4221_v58, %v2298_v25  ;;  %v4272_v34 = vsub.f32 %v63_v36, %v4251_v18 }
 0x141   :  { %2214 = vmatpush.msrb.mxu0 %v4147_v38  ;;  %2271 = vmatpush.msrb.mxu1 %v2270_v53  ;;  %v4291_v36 = vsub.f32 %v56_v27, %v4268_v47 }
 0x142   :  { %2146 = vmatpush.msra.mxu2 %v4476_v51  ;;  %2187 = vmatpush.msra.mxu3 %v3989_v21  ;;  %v2310_v21 = vand.u32 4294901760, %v4245_v28  ;;  %v2316_v53 = vand.u32 4294901760, %v4258_v56  ;;  %v2300_v41 = vand.u32 4294901760, %v2299_v11  ;;  %v2322_v12 = vand.u32 4294901760, %v4272_v34 }
 0x143   :  { %2216 = vmatpush.msrb.mxu0 %v4161_v40  ;;  %2277 = vmatpush.msrb.mxu1 %v2276_v31  ;;  %v4479_v31 = vand.u32 4294901760, %v4059_v59  ;;  %v2328_v27 = vand.u32 4294901760, %v4291_v36 }
 0x144   :  { %2150 = vmatpush.msra.mxu2 %v4477_v6  ;;  %2189 = vmatpush.msra.mxu3 %v4002_v22  ;;  %v2305_v22 = vsub.f32 %v4234_v63, %v2304_v19 }
 0x145   :  { %2218 = vmatpush.msrb.mxu0 %v4175_v29  ;;  %2283 = vmatpush.msrb.mxu1 %v2282_v44  ;;  %v4301_v44 = vsub.f32 %v49_v48, %v4281_v9  ;;  %v2329_v48 = vsub.f32 %v4291_v36, %v2328_v27 }
 0x146   :  { %2154 = vmatpush.msra.mxu2 %v4478_v35  ;;  %2191 = vmatpush.msra.mxu3 %v4015_v55  ;;  %v2311_v55 = vsub.f32 %v4245_v28, %v2310_v21  ;;  %v2306_v59 = vand.u32 4294901760, %v2305_v22  ;;  %v4480_v22 = vand.u32 4294901760, %v4110_v15 }
 0x147   :  { %2220 = vmatpush.msrb.mxu0 %v4195_v3  ;;  %2289 = vmatpush.msrb.mxu1 %v2288_v17  ;;  %v2334_v17 = vand.u32 4294901760, %v4301_v44 }
 0x148   :  { %2158 = vmatpush.msra.mxu2 %v4479_v31  ;;  %2193 = vmatpush.msra.mxu3 %v4027_v2  ;;  %v2317_v2 = vsub.f32 %v4258_v56, %v2316_v53  ;;  %v2312_v0 = vand.u32 4294901760, %v2311_v55  ;;  %v4481_v31 = vand.u32 4294901760, %v4125_v52 }
 0x149   :  { %2222 = vmatpush.msrb.mxu0 %v4208_v33  ;;  %2295 = vmatpush.msrb.mxu1 %v2294_v8  ;;  %v2335_v11 = vsub.f32 %v4301_v44, %v2334_v17  ;;  %v2330_v8 = vand.u32 4294901760, %v2329_v48 }
 0x14a   :  { %1897 = vmatmul.f32.vlgmr.msrb.gmra.mxu2 %v2956_v1  ;;  %2195 = vmatpush.msra.mxu3 %v4039_v49  ;;  %v2323_v49 = vsub.f32 %v4272_v34, %v2322_v12  ;;  %v2318_v51 = vand.u32 4294901760, %v2317_v2 }
 0x14b   :  { %2345 = vmatpush.msrb.mxu2 %v4101_v24  ;;  %2224 = vmatpush.msrb.mxu0 %v4218_v54  ;;  %v2336_v35 = vand.u32 4294901760, %v2335_v11 }
 0x14c   :  { %2301 = vmatpush.msrb.mxu1 %v2300_v41  ;;  %1998 = vmatmul.f32.vlgmr.msrb.gmra.mxu3 %v2864_v26  ;;  %v2324_v6 = vand.u32 4294901760, %v2323_v49 }
 0x14d   :  { %2348 = vmatpush.msrb.mxu2 %v4110_v15  ;;  %2398 = vmatpush.msrb.mxu3 %v4090_v60 }
 0x14e   :  { %2226 = vmatpush.msrb.mxu0 %v4231_v16  ;;  %2307 = vmatpush.msrb.mxu1 %v2306_v59 }
 0x14f   :  { %2351 = vmatpush.msrb.mxu2 %v4125_v52  ;;  %2400 = vmatpush.msrb.mxu3 %v4095_v45 }
 0x150   :  { %2228 = vmatpush.msrb.mxu0 %v4251_v18  ;;  %2313 = vmatpush.msrb.mxu1 %v2312_v0 }
 0x151   :  { %2354 = vmatpush.msrb.mxu2 %v4136_v46  ;;  %2402 = vmatpush.msrb.mxu3 %v4105_v32 }
 0x152   :  { %2230 = vmatpush.msrb.mxu0 %v4268_v47  ;;  %2319 = vmatpush.msrb.mxu1 %v2318_v51 }
 0x153   :  { %2160 = vmatmul.f32.vlgmr.msra.gmra.mxu2 %v2864_v26  ;;  %2404 = vmatpush.msrb.mxu3 %v4114_v14 }
 0x154   :  { %2357 = vmatpush.msrb.mxu2 %v4150_v13  ;;  %2232 = vmatpush.msrb.mxu0 %v4281_v9 }
 0x155   :  { %2325 = vmatpush.msrb.mxu1 %v2324_v6  ;;  %2052 = vmatmul.f32.vlgmr.msra.gmra.mxu0 %v2888_v7 }
 0x156   :  { %2197 = vmatmul.f32.vlgmr.msra.gmra.mxu3 %v2864_v26  ;;  %2360 = vmatpush.msrb.mxu2 %v4164_v42 }
 0x157   :  { %2406 = vmatpush.msrb.mxu3 %v4122_v50  ;;  %2439 = vmatpush.msra.mxu0 %v2244_v20 }
 0x158   :  { %2331 = vmatpush.msrb.mxu1 %v2330_v8  ;;  %2363 = vmatpush.msrb.mxu2 %v4178_v5 }
 0x159   :  { %2091 = vmatmul.f32.vlgmr.msra.gmra.mxu1 %v2914_v43  ;;  %2408 = vmatpush.msrb.mxu3 %v4133_v30 }
 0x15a   :  { %2443 = vmatpush.msra.mxu0 %v4480_v22  ;;  %2337 = vmatpush.msrb.mxu1 %v2336_v35 }
 0x15b   :  { %2366 = vmatpush.msrb.mxu2 %v4190_v39  ;;  %2410 = vmatpush.msrb.mxu3 %v4147_v38 }
 0x15c   :  { %2447 = vmatpush.msra.mxu0 %v4481_v31  ;;  %2506 = vmatpush.msra.mxu1 %v4090_v60 }
 0x15d   :  { %2369 = vmatpush.msrb.mxu2 %v4203_v62  ;;  %2412 = vmatpush.msrb.mxu3 %v4161_v40 }
 0x15e   :  { %2451 = vmatpush.msra.mxu0 %v2262_v23  ;;  %2508 = vmatpush.msra.mxu1 %v4095_v45 }
 0x15f   :  { %2372 = vmatpush.msrb.mxu2 %v4221_v58  ;;  %2414 = vmatpush.msrb.mxu3 %v4175_v29 }
 0x160   :  { %2455 = vmatpush.msra.mxu0 %v2268_v4  ;;  %2510 = vmatpush.msra.mxu1 %v4105_v32 }
 0x161   :  { %2375 = vmatpush.msrb.mxu2 %v4234_v63  ;;  %2416 = vmatpush.msrb.mxu3 %v4195_v3 }
 0x162   :  { %2459 = vmatpush.msra.mxu0 %v2274_v37  ;;  %2512 = vmatpush.msra.mxu1 %v4114_v14 }
 0x163   :  { %2378 = vmatpush.msrb.mxu2 %v4245_v28  ;;  %2418 = vmatpush.msrb.mxu3 %v4208_v33 }
 0x164   :  { %2463 = vmatpush.msra.mxu0 %v2280_v57  ;;  %2514 = vmatpush.msra.mxu1 %v4122_v50  ;;  %v1216_v52 = vpop.f32.mrf.mxu2 }
 0x165   :  { %2381 = vmatpush.msrb.mxu2 %v4258_v56  ;;  %2420 = vmatpush.msrb.mxu3 %v4218_v54 }
 0x166   :  { %2467 = vmatpush.msra.mxu0 %v2286_v10  ;;  %2516 = vmatpush.msra.mxu1 %v4133_v30 }
 0x167   :  { %2384 = vmatpush.msrb.mxu2 %v4272_v34  ;;  %2422 = vmatpush.msrb.mxu3 %v4231_v16 }
 0x168   :  { %2471 = vmatpush.msra.mxu0 %v2292_v61  ;;  %2518 = vmatpush.msra.mxu1 %v4147_v38  ;;  %v1317_v50 = vpop.f32.mrf.mxu3 }
 0x169   :  { %2387 = vmatpush.msrb.mxu2 %v4291_v36  ;;  %2424 = vmatpush.msrb.mxu3 %v4251_v18  ;;  %v1318_v14 = vadd.f32 %v1317_v50, %v1216_v52 }
 0x16a   :  { %2475 = vmatpush.msra.mxu0 %v2298_v25  ;;  %2520 = vmatpush.msra.mxu1 %v4161_v40 }
 0x16b   :  { %2390 = vmatpush.msrb.mxu2 %v4301_v44  ;;  %2426 = vmatpush.msrb.mxu3 %v4268_v47 }
 0x16c   :  { %2479 = vmatpush.msra.mxu0 %v2304_v19  ;;  %2522 = vmatpush.msra.mxu1 %v4175_v29  ;;  %v1371_v60 = vpop.f32.mrf.mxu0 }
 0x16d   :  { %2393 = vmatmul.f32.vlgmr.msrb.gmra.mxu2 %v2888_v7  ;;  %2428 = vmatpush.msrb.mxu3 %v4281_v9  ;;  %v1372_v45 = vadd.f32 %v1371_v60, %v1318_v14 }
 0x16e   :  { %2483 = vmatpush.msra.mxu0 %v2310_v21  ;;  %2524 = vmatpush.msra.mxu1 %v4195_v3 }
 0x16f   :  { %2238 = vmatmul.f32.vlgmr.msrb.gmra.mxu0 %v2956_v1  ;;  %2432 = vmatmul.f32.vlgmr.msrb.gmra.mxu3 %v2914_v43  ;;  %v1479_v32 = vpop.f32.mrf.mxu2 }
 0x170   :  { %2487 = vmatpush.msra.mxu0 %v2316_v53  ;;  %2526 = vmatpush.msra.mxu1 %v4208_v33  ;;  %v1410_v24 = vpop.f32.mrf.mxu1 }
 0x171   :  { %2339 = vmatmul.f32.vlgmr.msrb.gmra.mxu1 %v2864_v26  ;;  %v1411_v7 = vadd.f32 %v1410_v24, %v1372_v45 }
 0x172   :  { %2491 = vmatpush.msra.mxu0 %v2322_v12  ;;  %2528 = vmatpush.msra.mxu1 %v4218_v54  ;;  %v1516_v20 = vpop.f32.mrf.mxu3 }
 0x173   :  { %v1480_v15 = vadd.f32 %v1479_v32, %v1411_v7 }
 0x174   :  { %2495 = vmatpush.msra.mxu0 %v2328_v27  ;;  %2530 = vmatpush.msra.mxu1 %v4231_v16 }
 0x175   :  { %v1517_v43 = vadd.f32 %v1516_v20, %v1480_v15 }
 0x176   :  { %2499 = vmatpush.msra.mxu0 %v2334_v17  ;;  %2532 = vmatpush.msra.mxu1 %v4251_v18 }
 0x177   :  { %2501 = vmatmul.f32.vlgmr.msra.gmra.mxu0 %v2864_v26  ;;  %2545 = vst [vmem:[#allocation7 + $0x18] sm:$0xff] %v1517_v43 }
 0x178   :  { %2534 = vmatpush.msra.mxu1 %v4268_v47 }
 0x17a   :  { %2536 = vmatpush.msra.mxu1 %v4281_v9 }
 0x17b   :  { %2538 = vmatmul.f32.vlgmr.msra.gmra.mxu1 %v2864_v26 }
 0x18e   :  { %v1557_v1 = vpop.f32.mrf.mxu0 }
 0x192   :  { %v1658_v30 = vpop.f32.mrf.mxu1  ;;  %v1712_v46 = vpop.f32.mrf.mxu2 }
 0x193   :  { %v1659_v37 = vadd.f32 %v1658_v30, %v1557_v1 }
 0x195   :  { %v1713_v38 = vadd.f32 %v1712_v46, %v1659_v37  ;;  %v1751_v13 = vpop.f32.mrf.mxu3 }
 0x197   :  { %v1752_v23 = vadd.f32 %v1751_v13, %v1713_v38 }
 0x198   :  { %v1820_v40 = vpop.f32.mrf.mxu0 }
 0x199   :  { %v1821_v42 = vadd.f32 %v1820_v40, %v1752_v23 }
 0x19b   :  { %v1857_v4 = vpop.f32.mrf.mxu1 }
 0x19c   :  { %v1858_v29 = vadd.f32 %v1857_v4, %v1821_v42 }
 0x19e   :  { %2546 = vst [vmem:[#allocation7 + $0x20] sm:$0xff] %v1858_v29 }
 0x1cd   :  { %v1898_v5 = vpop.f32.mrf.mxu2 }
 0x1cf   :  { %v1999_v39 = vpop.f32.mrf.mxu3 }
 0x1d0   :  { %v2000_v3 = vadd.f32 %v1999_v39, %v1898_v5 }
 0x1d2   :  { %v2053_v57 = vpop.f32.mrf.mxu0 }
 0x1d3   :  { %v2054_v62 = vadd.f32 %v2053_v57, %v2000_v3 }
 0x1d6   :  { %v2092_v33 = vpop.f32.mrf.mxu1  ;;  %v2161_v10 = vpop.f32.mrf.mxu2 }
 0x1d7   :  { %v2093_v26 = vadd.f32 %v2092_v33, %v2054_v62 }
 0x1d9   :  { %v2162_v54 = vadd.f32 %v2161_v10, %v2093_v26  ;;  %v2198_v58 = vpop.f32.mrf.mxu3 }
 0x1db   :  { %v2199_v61 = vadd.f32 %v2198_v58, %v2162_v54 }
 0x1dd   :  { %2547 = vst [vmem:[#allocation7 + $0x28] sm:$0xff] %v2199_v61 }
 0x1ec   :  { %v2239_v16 = vpop.f32.mrf.mxu0 }
 0x1ee   :  { %v2340_v63 = vpop.f32.mrf.mxu1 }
 0x1ef   :  { %v2341_v25 = vadd.f32 %v2340_v63, %v2239_v16 }
 0x1f0   :  { %v2394_v28 = vpop.f32.mrf.mxu2 }
 0x1f1   :  { %v2395_v18 = vadd.f32 %v2394_v28, %v2341_v25 }
 0x1f2   :  { %v2433_v19 = vpop.f32.mrf.mxu3 }
 0x1f3   :  { %v2434_v56 = vadd.f32 %v2433_v19, %v2395_v18 }
 0x1f4   :  { %v2502_v21 = vpop.f32.mrf.mxu0 }
 0x1f5   :  { %v2503_v47 = vadd.f32 %v2502_v21, %v2434_v56 }
 0x1f8   :  { %v2539_v34 = vpop.f32.mrf.mxu1 }
 0x1f9   :  { %v2540_v53 = vadd.f32 %v2539_v34, %v2503_v47 }
 0x1fb   :  { %2548 = vst [vmem:[#allocation7 + $0x30] sm:$0xff] %v2540_v53 }
 0x1fc   :  { %2559 = dma.vmem_to_hbm [thread:$0]  %s2555_s1, 896, %s2557_s23, [#allocation4]  }
 0x1fd   :  { %2648 = dma.done.wait [#allocation4], 896  }
 0x1fe   :  { %2649 = vsyncadd [#allocation4], 4294966400 }
 0x1ff   :  { %2564 = vsyncpa [#allocation3], 1 }
 0x200   :  { %2565 = vsyncpa [#allocation6], 1 }
 0x201   :  { %2566 = vsyncpa [#allocation4], 1 }

</bundles_post_ra>
